<compile_context>
chip_gen: v6e
topology: v6e:2x2x1
jax: 0.10.0
libtpu: 0.0.40
codegen_flags: <defaults>
</compile_context>

<pallas_src>
import jax
import jax.numpy as jnp
from jax.experimental import pallas as pl
from jax.experimental.pallas import tpu as pltpu

INPUT = 6
INPUT_PAD = 8        # pad features to a sublane-aligned K
OUTPUT = 4
LAYER = 256
N_MID = 8            # hidden Linear(256,256)+ReLU layers after the first Linear
HEAD_PAD = 128       # packed head: mu in lanes 0:4, std in lanes 4:8, rest zero
SUBLANE = 16         # bf16 sublane packing for the batch-tile dimension
TM_CAP = 1024


def _round_up(n, m):
    return ((n + m - 1) // m) * m


def _make_kernel(rows_per_half, n_halves, ep_dtype):
    """Build the fused MLP kernel for a static tile split / epilogue dtype."""

    def kernel(x_ref, w0_ref, b0_ref, wm_ref, bm_ref, wh_ref, bh_ref, out_ref):
        w0 = w0_ref[...]
        b0 = b0_ref[...]
        wh = wh_ref[...]
        bh = bh_ref[...]

        # Hoisted once (JAX does not CSE broadcast_in_dim): lanes >= OUTPUT get
        # softplus (std lanes 4:8; the zero-weight pad lanes 8: are garbage and
        # sliced off in the wrapper). mu lanes 0:4 pass through untouched.
        lane = jax.lax.broadcasted_iota(jnp.int32, (rows_per_half, HEAD_PAD), 1)
        std_mask = lane >= OUTPUT

        def layer(h_bf16, w_bf16, bias):
            # MXU matmul with f32 accumulation; bias+ReLU epilogue in ep_dtype
            # (bf16 on v6e/v7x halves the VPU op count on the serial chain).
            acc = jnp.dot(h_bf16, w_bf16, preferred_element_type=jnp.float32)
            return jnp.maximum(acc.astype(ep_dtype) + bias, 0).astype(jnp.bfloat16)

        # Layer 0 for each independent row-half: two dependency chains let the
        # scheduler overlap one half's epilogue with the other half's matmul.
        hs = []
        for p in range(n_halves):
            xs = x_ref[pl.ds(p * rows_per_half, rows_per_half), :]
            hs.append(layer(xs, w0, b0))

        # Hidden Linear(256,256)+ReLU layers; both halves emitted per layer.
        for i in range(N_MID):
            wi = wm_ref[i]
            bi = bm_ref[i]
            hs = [layer(h, wi, bi) for h in hs]

        # Fused mu/std head (single matmul) + lane-masked stable softplus.
        for p in range(n_halves):
            z = jnp.dot(hs[p], wh, preferred_element_type=jnp.float32) + bh
            sp = jnp.maximum(z, 0.0) + jnp.log(1.0 + jnp.exp(-jnp.abs(z)))
            out = jnp.where(std_mask, sp, z)
            out_ref[pl.ds(p * rows_per_half, rows_per_half), :] = out.astype(out_ref.dtype)

    return kernel


def _bf16_epilogue_ok():
    # v4/v5 generations have no bf16 VPU; keep the f32 epilogue there.
    try:
        kind = jax.devices()[0].device_kind.lower()
    except Exception:
        return True
    return ("v4" not in kind) and ("v5" not in kind)


def _choose_tm(batch):
    b_pad = _round_up(batch, SUBLANE)
    if b_pad <= 2 * SUBLANE:
        return SUBLANE
    # Aim for >= 2 grid steps (keeps both v7x TensorCores busy and amortizes
    # the ~0.35us per-step overhead), capped so the live set fits scoped VMEM.
    return min(TM_CAP, _round_up((b_pad + 1) // 2, SUBLANE))


def stochastic_dqn_forward(x, params, tm=None):
    """Forward pass of Stochastic_DQN. Returns (mu, std), each (batch, OUTPUT)."""
    batch = x.shape[0]
    if tm is None:
        tm = _choose_tm(batch)
    tm = _round_up(tm, SUBLANE)
    b_pad = _round_up(batch, tm)

    # Pad features 6 -> 8, pad batch to a tile multiple, cast the input once.
    xp = jnp.pad(x, ((0, b_pad - batch), (0, INPUT_PAD - x.shape[1])))
    xp = xp.astype(jnp.bfloat16)

    ep_dtype = jnp.bfloat16 if _bf16_epilogue_ok() else jnp.float32
    b0 = params["b0"].astype(ep_dtype)
    bm = params["bm"].astype(ep_dtype)

    n_halves = 2 if (tm >= 64 and tm % 32 == 0) else 1
    rows = tm // n_halves

    grid = (b_pad // tm,)
    row = lambda i: (i, 0)        # batch-tiled arrays
    const2 = lambda i: (0, 0)     # weights resident across all grid steps
    const3 = lambda i: (0, 0, 0)

    out = pl.pallas_call(
        _make_kernel(rows, n_halves, ep_dtype),
        out_shape=jax.ShapeDtypeStruct((b_pad, HEAD_PAD), jnp.float32),
        grid=grid,
        in_specs=[
            pl.BlockSpec((tm, INPUT_PAD), row),            # x (pipelined, bf16)
            pl.BlockSpec((INPUT_PAD, LAYER), const2),      # w0 (padded 8x256)
            pl.BlockSpec((1, LAYER), const2),              # b0
            pl.BlockSpec((N_MID, LAYER, LAYER), const3),   # wm
            pl.BlockSpec((N_MID, 1, LAYER), const3),       # bm
            pl.BlockSpec((LAYER, HEAD_PAD), const2),       # packed mu|std weight
            pl.BlockSpec((1, HEAD_PAD), const2),           # packed mu|std bias
        ],
        out_specs=pl.BlockSpec((tm, HEAD_PAD), row),
        compiler_params=pltpu.CompilerParams(
            dimension_semantics=("parallel",),   # v7x: shard batch over 2 TCs
            vmem_limit_bytes=32 * 1024 * 1024,
        ),
    )(xp, params["w0"], b0, params["wm"], bm, params["w_head"], params["b_head"])

    return out[:batch, :OUTPUT], out[:batch, OUTPUT:2 * OUTPUT]


def _kaiming_uniform(key, out_features, in_features):
    # torch.nn.init.kaiming_uniform_(weight, nonlinearity='relu'):
    #   gain = sqrt(2); bound = sqrt(3) * gain / sqrt(fan_in) = sqrt(6 / fan_in)
    bound = jnp.sqrt(6.0 / in_features)
    return jax.random.uniform(key, (out_features, in_features),
                              dtype=jnp.float32, minval=-bound, maxval=bound)


def init_params(key):
    keys = jax.random.split(key, 11)
    # nn.Linear stores weight as (out, in); transpose to (in, out) for x @ W.
    w0 = _kaiming_uniform(keys[0], LAYER, INPUT).T                    # (6, 256)
    w0 = jnp.pad(w0, ((0, INPUT_PAD - INPUT), (0, 0)))                # (8, 256)
    wm = jnp.stack([_kaiming_uniform(keys[1 + i], LAYER, LAYER).T
                    for i in range(N_MID)], axis=0)                   # (8,256,256)
    w_mu = _kaiming_uniform(keys[9], OUTPUT, LAYER).T                 # (256, 4)
    w_std = _kaiming_uniform(keys[10], OUTPUT, LAYER).T               # (256, 4)

    # Fused head: mu in lanes 0:4, std in lanes 4:8, remaining lanes zero.
    w_head = jnp.zeros((LAYER, HEAD_PAD), jnp.float32)
    w_head = w_head.at[:, :OUTPUT].set(w_mu).at[:, OUTPUT:2 * OUTPUT].set(w_std)

    return {
        # bf16 weights; biases stored f32 (cast to the epilogue dtype per call).
        "w0": w0.astype(jnp.bfloat16),
        "b0": jnp.zeros((1, LAYER), jnp.float32),
        "wm": wm.astype(jnp.bfloat16),
        "bm": jnp.zeros((N_MID, 1, LAYER), jnp.float32),
        "w_head": w_head.astype(jnp.bfloat16),
        "b_head": jnp.zeros((1, HEAD_PAD), jnp.float32),
    }


def _reference_forward(x, params, ep_dtype=None):
    """Pure-JAX reference mirroring the kernel's bf16-operand / f32-accumulate math."""
    if ep_dtype is None:
        ep_dtype = jnp.bfloat16 if _bf16_epilogue_ok() else jnp.float32
    f32 = lambda a: a.astype(jnp.float32)
    xp = jnp.pad(x, ((0, 0), (0, INPUT_PAD - x.shape[1]))).astype(jnp.bfloat16)

    def layer(h_bf16, w, b):
        acc = f32(h_bf16) @ f32(w)
        return jnp.maximum(acc.astype(ep_dtype) + b.astype(ep_dtype), 0).astype(jnp.bfloat16)

    h = layer(xp, params["w0"], params["b0"])
    for i in range(N_MID):
        h = layer(h, params["wm"][i], params["bm"][i])
    z = f32(h) @ f32(params["w_head"]) + params["b_head"]
    mu = z[:, :OUTPUT]
    ls = z[:, OUTPUT:2 * OUTPUT]
    std = jnp.maximum(ls, 0.0) + jnp.log(1.0 + jnp.exp(-jnp.abs(ls)))
    return mu, std


if __name__ == "__main__":
    key = jax.random.PRNGKey(0)
    pkey, xkey = jax.random.split(key)
    params = init_params(pkey)

    batch = 2
    x = jax.random.normal(xkey, (batch, INPUT), dtype=jnp.float32)

    mu, std = stochastic_dqn_forward(x, params)
    mu = jax.block_until_ready(mu)
    std = jax.block_until_ready(std)

    mu_ref, std_ref = _reference_forward(x, params)
    assert mu.shape == (batch, OUTPUT) and std.shape == (batch, OUTPUT)
    assert bool(jnp.all(std >= 0.0))          # softplus output must be non-negative
    assert jnp.allclose(mu, mu_ref, atol=1e-2, rtol=1e-2)
    assert jnp.allclose(std, std_ref, atol=1e-2, rtol=1e-2)

    print("KERNEL_OK")
</pallas_src>

<mosaic_0001>
module attributes {stable_mosaic.version = 11 : i64} {
  func.func @kernel(%arg0: i32, %arg1: memref<16x8xbf16, #tpu.memory_space<vmem>>, %arg2: memref<8x256xbf16, #tpu.memory_space<vmem>>, %arg3: memref<1x256xbf16, #tpu.memory_space<vmem>>, %arg4: memref<8x256x256xbf16, #tpu.memory_space<vmem>>, %arg5: memref<8x1x256xbf16, #tpu.memory_space<vmem>>, %arg6: memref<256x128xbf16, #tpu.memory_space<vmem>>, %arg7: memref<1x128xf32, #tpu.memory_space<vmem>>, %arg8: memref<16x128xf32, #tpu.memory_space<vmem>>) attributes {dimension_semantics = [#tpu.dimension_semantics<parallel>], iteration_bounds = array<i64: 1>, scalar_prefetch = 0 : i64, scratch_operands = 0 : i64, tpu.core_type = #tpu.core_type<tc>, window_params = [{transform_indices = @transform_0, window_bounds = array<i64: 16, 8>}, {pipeline_mode = #tpu.pipeline_mode<synchronous>, transform_indices = @transform_1, window_bounds = array<i64: 8, 256>}, {pipeline_mode = #tpu.pipeline_mode<synchronous>, transform_indices = @transform_2, window_bounds = array<i64: 1, 256>}, {pipeline_mode = #tpu.pipeline_mode<synchronous>, transform_indices = @transform_3, window_bounds = array<i64: 8, 256, 256>}, {pipeline_mode = #tpu.pipeline_mode<synchronous>, transform_indices = @transform_4, window_bounds = array<i64: 8, 1, 256>}, {pipeline_mode = #tpu.pipeline_mode<synchronous>, transform_indices = @transform_5, window_bounds = array<i64: 256, 128>}, {pipeline_mode = #tpu.pipeline_mode<synchronous>, transform_indices = @transform_6, window_bounds = array<i64: 1, 128>}, {transform_indices = @transform_7, window_bounds = array<i64: 16, 128>}]} {
    %c0 = arith.constant 0 : index
    %c0_0 = arith.constant 0 : index
    %0 = vector.load %arg2[%c0, %c0_0] : memref<8x256xbf16, #tpu.memory_space<vmem>>, vector<8x256xbf16>
    %c0_1 = arith.constant 0 : index
    %c0_2 = arith.constant 0 : index
    %1 = vector.load %arg3[%c0_1, %c0_2] : memref<1x256xbf16, #tpu.memory_space<vmem>>, vector<1x256xbf16>
    %c0_3 = arith.constant 0 : index
    %c0_4 = arith.constant 0 : index
    %2 = vector.load %arg6[%c0_3, %c0_4] : memref<256x128xbf16, #tpu.memory_space<vmem>>, vector<256x128xbf16>
    %c0_5 = arith.constant 0 : index
    %c0_6 = arith.constant 0 : index
    %3 = vector.load %arg7[%c0_5, %c0_6] : memref<1x128xf32, #tpu.memory_space<vmem>>, vector<1x128xf32>
    %4 = tpu.iota {dimensions = array<i32: 1>} : vector<16x128xi32>
    %c4_i32 = arith.constant 4 : i32
    %5 = vector.broadcast %c4_i32 : i32 to vector<16x128xi32>
    %6 = arith.cmpi sge, %4, %5 : vector<16x128xi32>
    %c0_7 = arith.constant 0 : index
    %c0_8 = arith.constant 0 : index
    %7 = vector.load %arg1[%c0_7, %c0_8] : memref<16x8xbf16, #tpu.memory_space<vmem>>, vector<16x8xbf16>
    %cst = arith.constant dense<0.000000e+00> : vector<16x256xf32>
    %8 = tpu.matmul %7, %0, %cst {dimension_numbers = #tpu.dot_dimension_numbers<[1], [0], [0], [1], [0, 0, 1, 1], [], []>} : vector<16x8xbf16>, vector<8x256xbf16>, vector<16x256xf32> -> vector<16x256xf32>
    %9 = arith.truncf %8 : vector<16x256xf32> to vector<16x256xbf16>
    %10 = vector.broadcast %1 : vector<1x256xbf16> to vector<16x256xbf16>
    %11 = arith.addf %9, %10 : vector<16x256xbf16>
    %cst_9 = arith.constant 0.000000e+00 : bf16
    %12 = vector.broadcast %cst_9 : bf16 to vector<16x256xbf16>
    %13 = arith.maximumf %11, %12 : vector<16x256xbf16>
    %c0_10 = arith.constant 0 : index
    %c0_11 = arith.constant 0 : index
    %c0_12 = arith.constant 0 : index
    %14 = vector.load %arg4[%c0_10, %c0_11, %c0_12] : memref<8x256x256xbf16, #tpu.memory_space<vmem>>, vector<1x256x256xbf16>
    %15 = vector.shape_cast %14 : vector<1x256x256xbf16> to vector<256x256xbf16>
    %c0_13 = arith.constant 0 : index
    %c0_14 = arith.constant 0 : index
    %c0_15 = arith.constant 0 : index
    %16 = vector.load %arg5[%c0_13, %c0_14, %c0_15] : memref<8x1x256xbf16, #tpu.memory_space<vmem>>, vector<1x1x256xbf16>
    %17 = vector.shape_cast %16 : vector<1x1x256xbf16> to vector<1x256xbf16>
    %cst_16 = arith.constant dense<0.000000e+00> : vector<16x256xf32>
    %18 = tpu.matmul %13, %15, %cst_16 {dimension_numbers = #tpu.dot_dimension_numbers<[1], [0], [0], [1], [0, 0, 1, 1], [], []>} : vector<16x256xbf16>, vector<256x256xbf16>, vector<16x256xf32> -> vector<16x256xf32>
    %19 = arith.truncf %18 : vector<16x256xf32> to vector<16x256xbf16>
    %20 = vector.broadcast %17 : vector<1x256xbf16> to vector<16x256xbf16>
    %21 = arith.addf %19, %20 : vector<16x256xbf16>
    %cst_17 = arith.constant 0.000000e+00 : bf16
    %22 = vector.broadcast %cst_17 : bf16 to vector<16x256xbf16>
    %23 = arith.maximumf %21, %22 : vector<16x256xbf16>
    %c1 = arith.constant 1 : index
    %c0_18 = arith.constant 0 : index
    %c0_19 = arith.constant 0 : index
    %24 = vector.load %arg4[%c1, %c0_18, %c0_19] : memref<8x256x256xbf16, #tpu.memory_space<vmem>>, vector<1x256x256xbf16>
    %25 = vector.shape_cast %24 : vector<1x256x256xbf16> to vector<256x256xbf16>
    %c1_20 = arith.constant 1 : index
    %c0_21 = arith.constant 0 : index
    %c0_22 = arith.constant 0 : index
    %26 = vector.load %arg5[%c1_20, %c0_21, %c0_22] : memref<8x1x256xbf16, #tpu.memory_space<vmem>>, vector<1x1x256xbf16>
    %27 = vector.shape_cast %26 : vector<1x1x256xbf16> to vector<1x256xbf16>
    %cst_23 = arith.constant dense<0.000000e+00> : vector<16x256xf32>
    %28 = tpu.matmul %23, %25, %cst_23 {dimension_numbers = #tpu.dot_dimension_numbers<[1], [0], [0], [1], [0, 0, 1, 1], [], []>} : vector<16x256xbf16>, vector<256x256xbf16>, vector<16x256xf32> -> vector<16x256xf32>
    %29 = arith.truncf %28 : vector<16x256xf32> to vector<16x256xbf16>
    %30 = vector.broadcast %27 : vector<1x256xbf16> to vector<16x256xbf16>
    %31 = arith.addf %29, %30 : vector<16x256xbf16>
    %cst_24 = arith.constant 0.000000e+00 : bf16
    %32 = vector.broadcast %cst_24 : bf16 to vector<16x256xbf16>
    %33 = arith.maximumf %31, %32 : vector<16x256xbf16>
    %c2 = arith.constant 2 : index
    %c0_25 = arith.constant 0 : index
    %c0_26 = arith.constant 0 : index
    %34 = vector.load %arg4[%c2, %c0_25, %c0_26] : memref<8x256x256xbf16, #tpu.memory_space<vmem>>, vector<1x256x256xbf16>
    %35 = vector.shape_cast %34 : vector<1x256x256xbf16> to vector<256x256xbf16>
    %c2_27 = arith.constant 2 : index
    %c0_28 = arith.constant 0 : index
    %c0_29 = arith.constant 0 : index
    %36 = vector.load %arg5[%c2_27, %c0_28, %c0_29] : memref<8x1x256xbf16, #tpu.memory_space<vmem>>, vector<1x1x256xbf16>
    %37 = vector.shape_cast %36 : vector<1x1x256xbf16> to vector<1x256xbf16>
    %cst_30 = arith.constant dense<0.000000e+00> : vector<16x256xf32>
    %38 = tpu.matmul %33, %35, %cst_30 {dimension_numbers = #tpu.dot_dimension_numbers<[1], [0], [0], [1], [0, 0, 1, 1], [], []>} : vector<16x256xbf16>, vector<256x256xbf16>, vector<16x256xf32> -> vector<16x256xf32>
    %39 = arith.truncf %38 : vector<16x256xf32> to vector<16x256xbf16>
    %40 = vector.broadcast %37 : vector<1x256xbf16> to vector<16x256xbf16>
    %41 = arith.addf %39, %40 : vector<16x256xbf16>
    %cst_31 = arith.constant 0.000000e+00 : bf16
    %42 = vector.broadcast %cst_31 : bf16 to vector<16x256xbf16>
    %43 = arith.maximumf %41, %42 : vector<16x256xbf16>
    %c3 = arith.constant 3 : index
    %c0_32 = arith.constant 0 : index
    %c0_33 = arith.constant 0 : index
    %44 = vector.load %arg4[%c3, %c0_32, %c0_33] : memref<8x256x256xbf16, #tpu.memory_space<vmem>>, vector<1x256x256xbf16>
    %45 = vector.shape_cast %44 : vector<1x256x256xbf16> to vector<256x256xbf16>
    %c3_34 = arith.constant 3 : index
    %c0_35 = arith.constant 0 : index
    %c0_36 = arith.constant 0 : index
    %46 = vector.load %arg5[%c3_34, %c0_35, %c0_36] : memref<8x1x256xbf16, #tpu.memory_space<vmem>>, vector<1x1x256xbf16>
    %47 = vector.shape_cast %46 : vector<1x1x256xbf16> to vector<1x256xbf16>
    %cst_37 = arith.constant dense<0.000000e+00> : vector<16x256xf32>
    %48 = tpu.matmul %43, %45, %cst_37 {dimension_numbers = #tpu.dot_dimension_numbers<[1], [0], [0], [1], [0, 0, 1, 1], [], []>} : vector<16x256xbf16>, vector<256x256xbf16>, vector<16x256xf32> -> vector<16x256xf32>
    %49 = arith.truncf %48 : vector<16x256xf32> to vector<16x256xbf16>
    %50 = vector.broadcast %47 : vector<1x256xbf16> to vector<16x256xbf16>
    %51 = arith.addf %49, %50 : vector<16x256xbf16>
    %cst_38 = arith.constant 0.000000e+00 : bf16
    %52 = vector.broadcast %cst_38 : bf16 to vector<16x256xbf16>
    %53 = arith.maximumf %51, %52 : vector<16x256xbf16>
    %c4 = arith.constant 4 : index
    %c0_39 = arith.constant 0 : index
    %c0_40 = arith.constant 0 : index
    %54 = vector.load %arg4[%c4, %c0_39, %c0_40] : memref<8x256x256xbf16, #tpu.memory_space<vmem>>, vector<1x256x256xbf16>
    %55 = vector.shape_cast %54 : vector<1x256x256xbf16> to vector<256x256xbf16>
    %c4_41 = arith.constant 4 : index
    %c0_42 = arith.constant 0 : index
    %c0_43 = arith.constant 0 : index
    %56 = vector.load %arg5[%c4_41, %c0_42, %c0_43] : memref<8x1x256xbf16, #tpu.memory_space<vmem>>, vector<1x1x256xbf16>
    %57 = vector.shape_cast %56 : vector<1x1x256xbf16> to vector<1x256xbf16>
    %cst_44 = arith.constant dense<0.000000e+00> : vector<16x256xf32>
    %58 = tpu.matmul %53, %55, %cst_44 {dimension_numbers = #tpu.dot_dimension_numbers<[1], [0], [0], [1], [0, 0, 1, 1], [], []>} : vector<16x256xbf16>, vector<256x256xbf16>, vector<16x256xf32> -> vector<16x256xf32>
    %59 = arith.truncf %58 : vector<16x256xf32> to vector<16x256xbf16>
    %60 = vector.broadcast %57 : vector<1x256xbf16> to vector<16x256xbf16>
    %61 = arith.addf %59, %60 : vector<16x256xbf16>
    %cst_45 = arith.constant 0.000000e+00 : bf16
    %62 = vector.broadcast %cst_45 : bf16 to vector<16x256xbf16>
    %63 = arith.maximumf %61, %62 : vector<16x256xbf16>
    %c5 = arith.constant 5 : index
    %c0_46 = arith.constant 0 : index
    %c0_47 = arith.constant 0 : index
    %64 = vector.load %arg4[%c5, %c0_46, %c0_47] : memref<8x256x256xbf16, #tpu.memory_space<vmem>>, vector<1x256x256xbf16>
    %65 = vector.shape_cast %64 : vector<1x256x256xbf16> to vector<256x256xbf16>
    %c5_48 = arith.constant 5 : index
    %c0_49 = arith.constant 0 : index
    %c0_50 = arith.constant 0 : index
    %66 = vector.load %arg5[%c5_48, %c0_49, %c0_50] : memref<8x1x256xbf16, #tpu.memory_space<vmem>>, vector<1x1x256xbf16>
    %67 = vector.shape_cast %66 : vector<1x1x256xbf16> to vector<1x256xbf16>
    %cst_51 = arith.constant dense<0.000000e+00> : vector<16x256xf32>
    %68 = tpu.matmul %63, %65, %cst_51 {dimension_numbers = #tpu.dot_dimension_numbers<[1], [0], [0], [1], [0, 0, 1, 1], [], []>} : vector<16x256xbf16>, vector<256x256xbf16>, vector<16x256xf32> -> vector<16x256xf32>
    %69 = arith.truncf %68 : vector<16x256xf32> to vector<16x256xbf16>
    %70 = vector.broadcast %67 : vector<1x256xbf16> to vector<16x256xbf16>
    %71 = arith.addf %69, %70 : vector<16x256xbf16>
    %cst_52 = arith.constant 0.000000e+00 : bf16
    %72 = vector.broadcast %cst_52 : bf16 to vector<16x256xbf16>
    %73 = arith.maximumf %71, %72 : vector<16x256xbf16>
    %c6 = arith.constant 6 : index
    %c0_53 = arith.constant 0 : index
    %c0_54 = arith.constant 0 : index
    %74 = vector.load %arg4[%c6, %c0_53, %c0_54] : memref<8x256x256xbf16, #tpu.memory_space<vmem>>, vector<1x256x256xbf16>
    %75 = vector.shape_cast %74 : vector<1x256x256xbf16> to vector<256x256xbf16>
    %c6_55 = arith.constant 6 : index
    %c0_56 = arith.constant 0 : index
    %c0_57 = arith.constant 0 : index
    %76 = vector.load %arg5[%c6_55, %c0_56, %c0_57] : memref<8x1x256xbf16, #tpu.memory_space<vmem>>, vector<1x1x256xbf16>
    %77 = vector.shape_cast %76 : vector<1x1x256xbf16> to vector<1x256xbf16>
    %cst_58 = arith.constant dense<0.000000e+00> : vector<16x256xf32>
    %78 = tpu.matmul %73, %75, %cst_58 {dimension_numbers = #tpu.dot_dimension_numbers<[1], [0], [0], [1], [0, 0, 1, 1], [], []>} : vector<16x256xbf16>, vector<256x256xbf16>, vector<16x256xf32> -> vector<16x256xf32>
    %79 = arith.truncf %78 : vector<16x256xf32> to vector<16x256xbf16>
    %80 = vector.broadcast %77 : vector<1x256xbf16> to vector<16x256xbf16>
    %81 = arith.addf %79, %80 : vector<16x256xbf16>
    %cst_59 = arith.constant 0.000000e+00 : bf16
    %82 = vector.broadcast %cst_59 : bf16 to vector<16x256xbf16>
    %83 = arith.maximumf %81, %82 : vector<16x256xbf16>
    %c7 = arith.constant 7 : index
    %c0_60 = arith.constant 0 : index
    %c0_61 = arith.constant 0 : index
    %84 = vector.load %arg4[%c7, %c0_60, %c0_61] : memref<8x256x256xbf16, #tpu.memory_space<vmem>>, vector<1x256x256xbf16>
    %85 = vector.shape_cast %84 : vector<1x256x256xbf16> to vector<256x256xbf16>
    %c7_62 = arith.constant 7 : index
    %c0_63 = arith.constant 0 : index
    %c0_64 = arith.constant 0 : index
    %86 = vector.load %arg5[%c7_62, %c0_63, %c0_64] : memref<8x1x256xbf16, #tpu.memory_space<vmem>>, vector<1x1x256xbf16>
    %87 = vector.shape_cast %86 : vector<1x1x256xbf16> to vector<1x256xbf16>
    %cst_65 = arith.constant dense<0.000000e+00> : vector<16x256xf32>
    %88 = tpu.matmul %83, %85, %cst_65 {dimension_numbers = #tpu.dot_dimension_numbers<[1], [0], [0], [1], [0, 0, 1, 1], [], []>} : vector<16x256xbf16>, vector<256x256xbf16>, vector<16x256xf32> -> vector<16x256xf32>
    %89 = arith.truncf %88 : vector<16x256xf32> to vector<16x256xbf16>
    %90 = vector.broadcast %87 : vector<1x256xbf16> to vector<16x256xbf16>
    %91 = arith.addf %89, %90 : vector<16x256xbf16>
    %cst_66 = arith.constant 0.000000e+00 : bf16
    %92 = vector.broadcast %cst_66 : bf16 to vector<16x256xbf16>
    %93 = arith.maximumf %91, %92 : vector<16x256xbf16>
    %cst_67 = arith.constant dense<0.000000e+00> : vector<16x128xf32>
    %94 = tpu.matmul %93, %2, %cst_67 {dimension_numbers = #tpu.dot_dimension_numbers<[1], [0], [0], [1], [0, 0, 1, 1], [], []>} : vector<16x256xbf16>, vector<256x128xbf16>, vector<16x128xf32> -> vector<16x128xf32>
    %95 = vector.broadcast %3 : vector<1x128xf32> to vector<16x128xf32>
    %96 = arith.addf %94, %95 : vector<16x128xf32>
    %cst_68 = arith.constant 0.000000e+00 : f32
    %97 = vector.broadcast %cst_68 : f32 to vector<16x128xf32>
    %98 = arith.maximumf %96, %97 : vector<16x128xf32>
    %99 = math.absf %96 : vector<16x128xf32>
    %cst_69 = arith.constant 0.000000e+00 : f32
    %100 = vector.broadcast %cst_69 : f32 to vector<16x128xf32>
    %101 = arith.subf %100, %99 : vector<16x128xf32>
    %102 = math.exp %101 : vector<16x128xf32>
    %cst_70 = arith.constant 1.000000e+00 : f32
    %103 = vector.broadcast %cst_70 : f32 to vector<16x128xf32>
    %104 = arith.addf %103, %102 : vector<16x128xf32>
    %105 = math.log %104 : vector<16x128xf32>
    %106 = arith.addf %98, %105 : vector<16x128xf32>
    %107 = arith.select %6, %106, %96 : vector<16x128xi1>, vector<16x128xf32>
    %c0_71 = arith.constant 0 : index
    %c0_72 = arith.constant 0 : index
    %108 = vector.load %arg8[%c0_71, %c0_72] : memref<16x128xf32, #tpu.memory_space<vmem>>, vector<16x128xf32>
    tpu.vector_store %arg8[%c0_71, %c0_72], %107 {strides = array<i32>} : memref<16x128xf32, #tpu.memory_space<vmem>>, vector<16x128xf32>,
    return
  }
  func.func @transform_0(%arg0: i32) -> (i32, i32) {
    %c0_i32 = arith.constant 0 : i32
    %c0_i32_0 = arith.constant 0 : i32
    return %arg0, %c0_i32 : i32, i32
  }
  func.func @transform_1(%arg0: i32) -> (i32, i32) {
    %c0_i32 = arith.constant 0 : i32
    %c0_i32_0 = arith.constant 0 : i32
    %c0_i32_1 = arith.constant 0 : i32
    return %c0_i32, %c0_i32_0 : i32, i32
  }
  func.func @transform_2(%arg0: i32) -> (i32, i32) {
    %c0_i32 = arith.constant 0 : i32
    %c0_i32_0 = arith.constant 0 : i32
    %c0_i32_1 = arith.constant 0 : i32
    return %c0_i32, %c0_i32_0 : i32, i32
  }
  func.func @transform_3(%arg0: i32) -> (i32, i32, i32) {
    %c0_i32 = arith.constant 0 : i32
    %c0_i32_0 = arith.constant 0 : i32
    %c0_i32_1 = arith.constant 0 : i32
    %c0_i32_2 = arith.constant 0 : i32
    return %c0_i32, %c0_i32_0, %c0_i32_1 : i32, i32, i32
  }
  func.func @transform_4(%arg0: i32) -> (i32, i32, i32) {
    %c0_i32 = arith.constant 0 : i32
    %c0_i32_0 = arith.constant 0 : i32
    %c0_i32_1 = arith.constant 0 : i32
    %c0_i32_2 = arith.constant 0 : i32
    return %c0_i32, %c0_i32_0, %c0_i32_1 : i32, i32, i32
  }
  func.func @transform_5(%arg0: i32) -> (i32, i32) {
    %c0_i32 = arith.constant 0 : i32
    %c0_i32_0 = arith.constant 0 : i32
    %c0_i32_1 = arith.constant 0 : i32
    return %c0_i32, %c0_i32_0 : i32, i32
  }
  func.func @transform_6(%arg0: i32) -> (i32, i32) {
    %c0_i32 = arith.constant 0 : i32
    %c0_i32_0 = arith.constant 0 : i32
    %c0_i32_1 = arith.constant 0 : i32
    return %c0_i32, %c0_i32_0 : i32, i32
  }
  func.func @transform_7(%arg0: i32) -> (i32, i32) {
    %c0_i32 = arith.constant 0 : i32
    %c0_i32_0 = arith.constant 0 : i32
    return %arg0, %c0_i32 : i32, i32
  }
}

</mosaic_0001>

<bundles_post_ra>
// kernel: tpu_custom_call.1
= control target key start
LH: loop header
LB: loop body
LE: loop exit
PB: predicated region body
PF: predicated region fallthrough
CT: control target
= control target key end

     0   :  { %12 = vsyncpa [#allocation3], 0  ;;  %s3595_s0 = inlined_call_operand.vmem [shape: bf16[16,8], index: 0, kind: input, shape index: {}]   ;;  %s3596_s1 = inlined_call_operand.vmem [shape: bf16[8,256], index: 1, kind: input, shape index: {}]   ;;  %s3597_s2 = inlined_call_operand.vmem [shape: bf16[1,256], index: 2, kind: input, shape index: {}]   ;;  %s3598_s3 = inlined_call_operand.hbm [shape: bf16[8,256,256], index: 3, kind: input, shape index: {}]   ;;  %s3599_s4 = inlined_call_operand.vmem [shape: bf16[8,1,256], index: 4, kind: input, shape index: {}]   ;;  %s3600_s5 = inlined_call_operand.hbm [shape: bf16[256,128], index: 5, kind: input, shape index: {}]   ;;  %s3601_s6 = inlined_call_operand.vmem [shape: f32[1,128], index: 6, kind: input, shape index: {}]   ;;  %s3602_s7 = inlined_call_operand.hbm [shape: f32[16,128], index: 7, kind: output, shape index: {}]  }
   0x1   :  { %13 = vsyncpa [#allocation6], 0 }
   0x2   :  { %14 = vsyncpa [#allocation4], 0  ;;  %s3434_s24 = smov [#allocation2]  }
   0x3   :  { %s26_s25 = sshll.u32 %s3434_s24, 4  ;;  %s27_s25 = int_to_ptr.vmem [resolvable:$true] %s26_s25 }
   0x4   :  { %s3376_s26 = scalar_lea.vmem %s27_s25, 32768  ;;  %p3381_p1 = scmp.lt.s32.totalorder %s27_s25, %s27_s25 }
   0x5   :  { %p3377_p0 = scmp.ne.s32.totalorder %s27_s25, %s3376_s26  ;;  %p3382_p2 = scmp.lt.s32.totalorder %s3376_s26, %s3376_s26 }
   0x7   :  { %p3383_p3 = por %p3382_p2, %p3381_p1 }
   0x9   :  { %p3384_p4 = pnand %p3383_p3, %p3377_p0 }
   0xb   :  { %3387 = shalt.err (!%p3384_p4)
}
   0xc   :  { %s3435_s27 = smov 128   ;;  %s3436_s28 = smov 8  }
   0xd   :  { %32 = dma.hbm_to_vmem [thread:$0]  %s3598_s3, 32768, %s27_s25, [#allocation3], %s3435_s27, %s3435_s27, %s3436_s28  }
   0xe   :  { %s3437_s8 = smov [#allocation5]  }
   0xf   :  { %s40_s9 = sshll.u32 %s3437_s8, 4  ;;  %s41_s9 = int_to_ptr.vmem [resolvable:$true] %s40_s9 }
  0x10   :  { %s3396_s10 = scalar_lea.vmem %s41_s9, 2048  ;;  %p3401_p6 = scmp.lt.s32.totalorder %s41_s9, %s41_s9 }
  0x11   :  { %p3397_p5 = scmp.ne.s32.totalorder %s41_s9, %s3396_s10  ;;  %p3402_p7 = scmp.lt.s32.totalorder %s3396_s10, %s3396_s10 }
  0x13   :  { %p3403_p8 = por %p3402_p7, %p3401_p6 }
  0x15   :  { %p3404_p9 = pnand %p3403_p8, %p3397_p5 }
  0x17   :  { %3407 = shalt.err (!%p3404_p9)
}
  0x18   :  { %s3438_s11 = smov 64   ;;  %s3439_s12 = smov 4  }
  0x19   :  { %46 = dma.hbm_to_vmem [thread:$0]  %s3600_s5, 2048, %s41_s9, [#allocation6], %s3438_s11, %s3438_s11, %s3439_s12  }
  0x1a   :  { %3428 = dma.done.wait [#allocation3], 32768  }
  0x1b   :  { %3429 = vsyncadd [#allocation3], 4294934528 }
  0x1c   :  { %3430 = dma.done.wait [#allocation6], 2048  }
  0x1d   :  { %3431 = vsyncadd [#allocation6], 4294965248  ;;  %v3440_v0 = vmov 0   ;;  %v56_v1 = vld [vmem:[%s3596_s1] sm:$0xff]  ;;  %vm110_vm0 = vcmask 1043456   ;;  %vm106_vm1 = vcmask 64512  }
  0x1e   :  { %149 = vmatprep.mubr.bf16.mxu0 %v3440_v0  ;;  %v2634_v2 = vcombine.high %v56_v1, %v56_v1  ;;  %v2633_v3 = vcombine.low %v56_v1, %v56_v1  ;;  %v2960_v4 = vld [vmem:[#allocation2 + $0x74] ss:$8 sps:$4 sm:$0xff]   ;;  %v2962_v5 = vld [vmem:[#allocation2 + $0x70] ss:$8 sps:$4 sm:$0xff]   ;;  %v2959_v7 = vld [vmem:[%s3595_s0] sm:$0xff]   ;;  %v91_v1 = vlaneseq }
  0x1f   :  { %v2963_v8 = vld [vmem:[#allocation2 + $0x64] ss:$8 sps:$4 sm:$0xff]   ;;  %396 = vmatprep.subr.bf16.mxu1 %v2960_v4  ;;  %v2965_v9 = vld [vmem:[#allocation2 + $0x60] ss:$8 sps:$4 sm:$0xff]   ;;  %v2966_v10 = vld [vmem:[#allocation2 + $0x54] ss:$8 sps:$4 sm:$0xff]  }
  0x20   :  { %2635 = vmatprep.subr.msk.bf16.mxu0 %vm110_vm0, %v2634_v2  ;;  %v112_v6 = vsel %vm110_vm0, %v2633_v3, 0  ;;  %397 = vmatpush1.bf16.msra.mxu1 %v2962_v5  ;;  %v2968_v11 = vld [vmem:[#allocation2 + $0x50] ss:$8 sps:$4 sm:$0xff]   ;;  %v2969_v12 = vld [vmem:[#allocation2 + $0x44] ss:$8 sps:$4 sm:$0xff]   ;;  %v175_v5 = vshrl.u32 %v91_v1, 7 }
  0x21   :  { %132 = vmatpush1.bf16.msra.mxu0 %v112_v6  ;;  %398 = vmatprep.subr.bf16.mxu1 %v2963_v8  ;;  %v2971_v13 = vld [vmem:[#allocation2 + $0x40] ss:$8 sps:$4 sm:$0xff]   ;;  %v2972_v14 = vld [vmem:[#allocation2 + $0x34] ss:$8 sps:$4 sm:$0xff]   ;;  %v2974_v15 = vld [vmem:[#allocation2 + $0x30] ss:$8 sps:$4 sm:$0xff]  }
  0x22   :  { %v2975_v16 = vld [vmem:[#allocation2 + $0x24] ss:$8 sps:$4 sm:$0xff]   ;;  %v2977_v17 = vld [vmem:[#allocation2 + $0x20] ss:$8 sps:$4 sm:$0xff]   ;;  %v2978_v18 = vld [vmem:[#allocation2 + $0x14] ss:$8 sps:$4 sm:$0xff]  }
  0x23   :  { %v2980_v19 = vld [vmem:[#allocation2 + $0x10] ss:$8 sps:$4 sm:$0xff]   ;;  %v2981_v20 = vld [vmem:[#allocation2 + $0x4] ss:$8 sps:$4 sm:$0xff]   ;;  %v2983_v21 = vld [vmem:[#allocation2] ss:$8 sps:$4 sm:$0xff]  }
  0x24   :  { %2636 = vmatmul.mubr.msk.bf16.vlgmr.msra.gmra.mxu0 %vm106_vm1, %v2959_v7  ;;  %399 = vmatpush1.bf16.msra.mxu1 %v2965_v9  ;;  %v2984_v22 = vld [vmem:[#allocation2 + $0xf4] ss:$8 sps:$4 sm:$0xff]   ;;  %v2986_v23 = vld [vmem:[#allocation2 + $0xf0] ss:$8 sps:$4 sm:$0xff]   ;;  %v2987_v24 = vld [vmem:[#allocation2 + $0xe4] ss:$8 sps:$4 sm:$0xff]  }
  0x25   :  { %400 = vmatprep.subr.bf16.mxu1 %v2966_v10  ;;  %v2989_v25 = vld [vmem:[#allocation2 + $0xe0] ss:$8 sps:$4 sm:$0xff]   ;;  %v2990_v26 = vld [vmem:[#allocation2 + $0xd4] ss:$8 sps:$4 sm:$0xff]   ;;  %v2992_v27 = vld [vmem:[#allocation2 + $0xd0] ss:$8 sps:$4 sm:$0xff]  }
  0x26   :  { %v2993_v28 = vld [vmem:[#allocation2 + $0xc4] ss:$8 sps:$4 sm:$0xff]   ;;  %v2995_v29 = vld [vmem:[#allocation2 + $0xc0] ss:$8 sps:$4 sm:$0xff]   ;;  %v2996_v30 = vld [vmem:[#allocation2 + $0xb4] ss:$8 sps:$4 sm:$0xff]  }
  0x27   :  { %v2998_v31 = vld [vmem:[#allocation2 + $0xb0] ss:$8 sps:$4 sm:$0xff]   ;;  %v2999_v32 = vld [vmem:[#allocation2 + $0xa4] ss:$8 sps:$4 sm:$0xff]   ;;  %v3001_v33 = vld [vmem:[#allocation2 + $0xa0] ss:$8 sps:$4 sm:$0xff]  }
  0x28   :  { %401 = vmatpush1.bf16.msra.mxu1 %v2968_v11  ;;  %v3002_v34 = vld [vmem:[#allocation2 + $0x94] ss:$8 sps:$4 sm:$0xff]   ;;  %v3004_v35 = vld [vmem:[#allocation2 + $0x90] ss:$8 sps:$4 sm:$0xff]   ;;  %v3005_v36 = vld [vmem:[#allocation2 + $0x84] ss:$8 sps:$4 sm:$0xff]  }
  0x29   :  { %402 = vmatprep.subr.bf16.mxu1 %v2969_v12  ;;  %v3007_v37 = vld [vmem:[#allocation2 + $0x80] ss:$8 sps:$4 sm:$0xff]   ;;  %v3008_v38 = vld [vmem:[#allocation2 + $0x170] ss:$8 sps:$4 sm:$0xff]   ;;  %v3010_v39 = vld [vmem:[#allocation2 + $0x174] ss:$8 sps:$4 sm:$0xff]  }
  0x2a   :  { %v3013_v40 = vld [vmem:[#allocation2 + $0x164] ss:$8 sps:$4 sm:$0xff]   ;;  %677 = vmatprep.subr.bf16.mxu0 %v3010_v39  ;;  %v3011_v41 = vld [vmem:[#allocation2 + $0x160] ss:$8 sps:$4 sm:$0xff]   ;;  %v3016_v42 = vld [vmem:[#allocation2 + $0x154] ss:$8 sps:$4 sm:$0xff]  }
  0x2b   :  { %678 = vmatpush1.bf16.msra.mxu0 %v3008_v38  ;;  %v3014_v43 = vld [vmem:[#allocation2 + $0x150] ss:$8 sps:$4 sm:$0xff]   ;;  %v3019_v44 = vld [vmem:[#allocation2 + $0x144] ss:$8 sps:$4 sm:$0xff]   ;;  %v3017_v45 = vld [vmem:[#allocation2 + $0x140] ss:$8 sps:$4 sm:$0xff]  }
  0x2c   :  { %403 = vmatpush1.bf16.msra.mxu1 %v2971_v13  ;;  %679 = vmatprep.subr.bf16.mxu0 %v3013_v40  ;;  %v3022_v46 = vld [vmem:[#allocation2 + $0x134] ss:$8 sps:$4 sm:$0xff]   ;;  %v3020_v47 = vld [vmem:[#allocation2 + $0x130] ss:$8 sps:$4 sm:$0xff]   ;;  %v3025_v48 = vld [vmem:[#allocation2 + $0x124] ss:$8 sps:$4 sm:$0xff]  }
  0x2d   :  { %404 = vmatprep.subr.bf16.mxu1 %v2972_v14  ;;  %v3023_v49 = vld [vmem:[#allocation2 + $0x120] ss:$8 sps:$4 sm:$0xff]   ;;  %v3028_v50 = vld [vmem:[#allocation2 + $0x114] ss:$8 sps:$4 sm:$0xff]   ;;  %v3026_v51 = vld [vmem:[#allocation2 + $0x110] ss:$8 sps:$4 sm:$0xff]  }
  0x2e   :  { %v3031_v52 = vld [vmem:[#allocation2 + $0x104] ss:$8 sps:$4 sm:$0xff]   ;;  %v3029_v53 = vld [vmem:[#allocation2 + $0x100] ss:$8 sps:$4 sm:$0xff]   ;;  %v3034_v54 = vld [vmem:[#allocation2 + $0x1f4] ss:$8 sps:$4 sm:$0xff]  }
  0x2f   :  { %680 = vmatpush1.bf16.msra.mxu0 %v3011_v41  ;;  %v3032_v55 = vld [vmem:[#allocation2 + $0x1f0] ss:$8 sps:$4 sm:$0xff]   ;;  %v3037_v56 = vld [vmem:[#allocation2 + $0x1e4] ss:$8 sps:$4 sm:$0xff]   ;;  %v3035_v57 = vld [vmem:[#allocation2 + $0x1e0] ss:$8 sps:$4 sm:$0xff]  }
  0x30   :  { %405 = vmatpush1.bf16.msra.mxu1 %v2974_v15  ;;  %681 = vmatprep.subr.bf16.mxu0 %v3016_v42  ;;  %v3040_v58 = vld [vmem:[#allocation2 + $0x1d4] ss:$8 sps:$4 sm:$0xff]   ;;  %v3038_v59 = vld [vmem:[#allocation2 + $0x1d0] ss:$8 sps:$4 sm:$0xff]   ;;  %v3043_v60 = vld [vmem:[#allocation2 + $0x1c4] ss:$8 sps:$4 sm:$0xff]  }
  0x31   :  { %406 = vmatprep.subr.bf16.mxu1 %v2975_v16  ;;  %v3041_v61 = vld [vmem:[#allocation2 + $0x1c0] ss:$8 sps:$4 sm:$0xff]   ;;  %v3046_v62 = vld [vmem:[#allocation2 + $0x1b4] ss:$8 sps:$4 sm:$0xff]   ;;  %v3044_v63 = vld [vmem:[#allocation2 + $0x1b0] ss:$8 sps:$4 sm:$0xff]  }
  0x32   :  { %v3441_v2 = vmov 1966171168   ;;  %v2637_v6 = vld.sshfl [vmem:[%s3597_s2] sm:$0x11 pattern:$0x75316420] }
  0x33   :  { %682 = vmatpush1.bf16.msra.mxu0 %v3014_v43  ;;  %v172_v3 = vunpack.c.l.s4 %v3441_v2  ;;  %v170_v8 = vcombine.high %v2637_v6, %v2637_v6  ;;  %v3507_v13 = vsub.s32 0, %v175_v5  ;;  %v3067_v38 = vld [vmem:[#allocation2 + $0x244] ss:$8 sps:$4 sm:$0xff]   ;;  %v3065_v39 = vld [vmem:[#allocation2 + $0x240] ss:$8 sps:$4 sm:$0xff]  }
  0x34   :  { %407 = vmatpush1.bf16.msra.mxu1 %v2977_v17  ;;  %683 = vmatprep.subr.bf16.mxu0 %v3019_v44  ;;  %v3070_v40 = vld [vmem:[#allocation2 + $0x234] ss:$8 sps:$4 sm:$0xff]   ;;  %v3068_v41 = vld [vmem:[#allocation2 + $0x230] ss:$8 sps:$4 sm:$0xff]   ;;  %v3073_v42 = vld [vmem:[#allocation2 + $0x224] ss:$8 sps:$4 sm:$0xff]  }
  0x35   :  { %408 = vmatprep.subr.bf16.mxu1 %v2978_v18  ;;  %v173_v4 = vunpack.c.0.s8 %v172_v3  ;;  %v3071_v43 = vld [vmem:[#allocation2 + $0x220] ss:$8 sps:$4 sm:$0xff]   ;;  %v3076_v44 = vld [vmem:[#allocation2 + $0x214] ss:$8 sps:$4 sm:$0xff]  }
  0x37   :  { %684 = vmatpush1.bf16.msra.mxu0 %v3017_v45  ;;  %v3503_v7 = vsub.s32 %v173_v4, %v175_v5  ;;  %v3074_v45 = vld [vmem:[#allocation2 + $0x210] ss:$8 sps:$4 sm:$0xff]  }
  0x38   :  { %409 = vmatpush1.bf16.msra.mxu1 %v2980_v19  ;;  %685 = vmatprep.subr.bf16.mxu0 %v3022_v46  ;;  %v3079_v46 = vld [vmem:[#allocation2 + $0x204] ss:$8 sps:$4 sm:$0xff]  }
  0x39   :  { %410 = vmatprep.subr.bf16.mxu1 %v2981_v20  ;;  %v177_v9 = vrot.slane %v2637_v6, %v3503_v7  ;;  %v184_v10 = vrot.slane %v170_v8, %v3503_v7 }
  0x3b   :  { %686 = vmatpush1.bf16.msra.mxu0 %v3020_v47  ;;  %v186_v12 = vpack.i.b16 %v177_v9, %v177_v9  ;;  %v193_v14 = vpack.i.b16 %v184_v10, %v184_v10  ;;  %v3077_v47 = vld [vmem:[#allocation2 + $0x200] ss:$8 sps:$4 sm:$0xff]  }
  0x3c   :  { %411 = vmatpush1.bf16.msra.mxu1 %v2983_v21  ;;  %687 = vmatprep.subr.bf16.mxu0 %v3025_v48  ;;  %v3082_v48 = vld [vmem:[#allocation2 + $0x2f4] ss:$8 sps:$4 sm:$0xff]  }
  0x3d   :  { %412 = vmatprep.subr.bf16.mxu1 %v2984_v22  ;;  %v191_v17 = vrot.slane %v186_v12, %v3507_v13  ;;  %v198_v19 = vrot.slane %v193_v14, %v3507_v13 }
  0x3f   :  { %688 = vmatpush1.bf16.msra.mxu0 %v3023_v49  ;;  %v3080_v49 = vld [vmem:[#allocation2 + $0x2f0] ss:$8 sps:$4 sm:$0xff]  }
  0x40   :  { %413 = vmatpush2.bf16.msra.mxu1 %v2986_v23  ;;  %689 = vmatprep.subr.bf16.mxu0 %v3028_v50  ;;  %v3085_v50 = vld [vmem:[#allocation2 + $0x2e4] ss:$8 sps:$4 sm:$0xff]  }
  0x41   :  { %414 = vmatprep.subr.bf16.mxu1 %v2987_v24 }
  0x43   :  { %690 = vmatpush1.bf16.msra.mxu0 %v3026_v51  ;;  %v3083_v51 = vld [vmem:[#allocation2 + $0x2e0] ss:$8 sps:$4 sm:$0xff]  }
  0x44   :  { %415 = vmatpush2.bf16.msra.mxu1 %v2989_v25  ;;  %691 = vmatprep.subr.bf16.mxu0 %v3031_v52  ;;  %v3088_v52 = vld [vmem:[#allocation2 + $0x2d4] ss:$8 sps:$4 sm:$0xff]  }
  0x45   :  { %416 = vmatprep.subr.bf16.mxu1 %v2990_v26  ;;  %v3049_v26 = vld [vmem:[#allocation2 + $0x1a4] ss:$8 sps:$4 sm:$0xff]  }
  0x47   :  { %692 = vmatpush1.bf16.msra.mxu0 %v3029_v53  ;;  %v3086_v53 = vld [vmem:[#allocation2 + $0x2d0] ss:$8 sps:$4 sm:$0xff]  }
  0x48   :  { %417 = vmatpush2.bf16.msra.mxu1 %v2992_v27  ;;  %693 = vmatprep.subr.bf16.mxu0 %v3034_v54  ;;  %v3047_v27 = vld [vmem:[#allocation2 + $0x1a0] ss:$8 sps:$4 sm:$0xff]   ;;  %v3091_v54 = vld [vmem:[#allocation2 + $0x2c4] ss:$8 sps:$4 sm:$0xff]  }
  0x49   :  { %418 = vmatprep.subr.bf16.mxu1 %v2993_v28  ;;  %v3052_v28 = vld [vmem:[#allocation2 + $0x194] ss:$8 sps:$4 sm:$0xff]  }
  0x4b   :  { %694 = vmatpush2.bf16.msra.mxu0 %v3032_v55  ;;  %v3089_v55 = vld [vmem:[#allocation2 + $0x2c0] ss:$8 sps:$4 sm:$0xff]  }
  0x4c   :  { %419 = vmatpush2.bf16.msra.mxu1 %v2995_v29  ;;  %695 = vmatprep.subr.bf16.mxu0 %v3037_v56  ;;  %v3050_v29 = vld [vmem:[#allocation2 + $0x190] ss:$8 sps:$4 sm:$0xff]   ;;  %v3094_v56 = vld [vmem:[#allocation2 + $0x2b4] ss:$8 sps:$4 sm:$0xff]  }
  0x4d   :  { %420 = vmatprep.subr.bf16.mxu1 %v2996_v30  ;;  %v3055_v30 = vld [vmem:[#allocation2 + $0x184] ss:$8 sps:$4 sm:$0xff]  }
  0x4f   :  { %696 = vmatpush2.bf16.msra.mxu0 %v3035_v57  ;;  %v3092_v57 = vld [vmem:[#allocation2 + $0x2b0] ss:$8 sps:$4 sm:$0xff]  }
  0x50   :  { %421 = vmatpush2.bf16.msra.mxu1 %v2998_v31  ;;  %697 = vmatprep.subr.bf16.mxu0 %v3040_v58  ;;  %v3053_v31 = vld [vmem:[#allocation2 + $0x180] ss:$8 sps:$4 sm:$0xff]  }
  0x51   :  { %422 = vmatprep.subr.bf16.mxu1 %v2999_v32  ;;  %v3056_v32 = vld [vmem:[#allocation2 + $0x270] ss:$8 sps:$4 sm:$0xff]   ;;  %v2670_v58 = vld.sshfl [vmem:[%s3599_s4] sm:$0x11 pattern:$0x75316420] }
  0x53   :  { %698 = vmatpush2.bf16.msra.mxu0 %v3038_v59  ;;  %v449_v59 = vcombine.high %v2670_v58, %v2670_v58 }
  0x54   :  { %423 = vmatpush2.bf16.msra.mxu1 %v3001_v33  ;;  %699 = vmatprep.subr.bf16.mxu0 %v3043_v60  ;;  %v3058_v33 = vld [vmem:[#allocation2 + $0x274] ss:$8 sps:$4 sm:$0xff]   ;;  %v456_v60 = vrot.slane %v2670_v58, %v3503_v7 }
  0x55   :  { %424 = vmatprep.subr.bf16.mxu1 %v3002_v34  ;;  %v3061_v34 = vld [vmem:[#allocation2 + $0x264] ss:$8 sps:$4 sm:$0xff]  }
  0x57   :  { %700 = vmatpush2.bf16.msra.mxu0 %v3041_v61  ;;  %v463_v61 = vrot.slane %v449_v59, %v3503_v7 }
  0x58   :  { %425 = vmatpush2.bf16.msra.mxu1 %v3004_v35  ;;  %701 = vmatprep.subr.bf16.mxu0 %v3046_v62  ;;  %v3059_v35 = vld [vmem:[#allocation2 + $0x260] ss:$8 sps:$4 sm:$0xff]  }
  0x59   :  { %426 = vmatprep.subr.bf16.mxu1 %v3005_v36  ;;  %v3064_v36 = vld [vmem:[#allocation2 + $0x254] ss:$8 sps:$4 sm:$0xff]   ;;  %v472_v2 = vpack.i.b16 %v463_v61, %v463_v61 }
  0x5b   :  { %702 = vmatpush2.bf16.msra.mxu0 %v3044_v63  ;;  %v465_v63 = vpack.i.b16 %v456_v60, %v456_v60  ;;  %v477_v8 = vrot.slane %v472_v2, %v3507_v13 }
  0x5c   :  { %427 = vmatpush2.bf16.msra.mxu1 %v3007_v37  ;;  %703 = vmatprep.subr.bf16.mxu0 %v3049_v26  ;;  %v3062_v37 = vld [vmem:[#allocation2 + $0x250] ss:$8 sps:$4 sm:$0xff]   ;;  %v3112_v26 = vld [vmem:[#allocation2 + $0x354] ss:$8 sps:$4 sm:$0xff]  }
  0x5d   :  { %958 = vmatprep.subr.bf16.mxu1 %v3058_v33  ;;  %v470_v5 = vrot.slane %v465_v63, %v3507_v13  ;;  %v3119_v33 = vld [vmem:[#allocation2 + $0x320] ss:$8 sps:$4 sm:$0xff]  }
  0x5f   :  { %704 = vmatpush2.bf16.msra.mxu0 %v3047_v27  ;;  %v3110_v27 = vld [vmem:[#allocation2 + $0x350] ss:$8 sps:$4 sm:$0xff]  }
  0x60   :  { %705 = vmatprep.subr.bf16.mxu0 %v3052_v28  ;;  %v3115_v28 = vld [vmem:[#allocation2 + $0x344] ss:$8 sps:$4 sm:$0xff]  }
  0x63   :  { %706 = vmatpush2.bf16.msra.mxu0 %v3050_v29  ;;  %v3113_v29 = vld [vmem:[#allocation2 + $0x340] ss:$8 sps:$4 sm:$0xff]  }
  0x64   :  { %707 = vmatprep.subr.bf16.mxu0 %v3055_v30  ;;  %v3118_v30 = vld [vmem:[#allocation2 + $0x334] ss:$8 sps:$4 sm:$0xff]  }
  0x67   :  { %708 = vmatpush2.bf16.msra.mxu0 %v3053_v31  ;;  %v3116_v31 = vld [vmem:[#allocation2 + $0x330] ss:$8 sps:$4 sm:$0xff]  }
  0xe4   :  { %v151_v11 = vpop.f32.mrf.mxu0 }
  0xe6   :  { %v153_v15 = vpop.f32.mrf.mxu0 }
  0xe8   :  { %v155_v16 = vpop.f32.mrf.mxu0 }
  0xe9   :  { %v160_v18 = vpack.c.bf16 %v155_v16, %v151_v11  ;;  %v3097_v16 = vld [vmem:[#allocation2 + $0x2a4] ss:$8 sps:$4 sm:$0xff]  }
  0xea   :  { %v157_v20 = vpop.f32.mrf.mxu0 }
  0xeb   :  { %v161_v21 = vpack.c.bf16 %v157_v20, %v153_v15  ;;  %v199_v22 = vadd.bf16 %v191_v17, %v160_v18  ;;  %v3095_v17 = vld [vmem:[#allocation2 + $0x2a0] ss:$8 sps:$4 sm:$0xff]   ;;  %v3100_v18 = vld [vmem:[#allocation2 + $0x294] ss:$8 sps:$4 sm:$0xff]   ;;  %v3103_v20 = vld [vmem:[#allocation2 + $0x284] ss:$8 sps:$4 sm:$0xff]  }
  0xed   :  { %v200_v23 = vadd.bf16 %v198_v19, %v161_v21  ;;  %v201_v25 = vmax.bf16 %v3440_v0, %v199_v22  ;;  %v3098_v19 = vld [vmem:[#allocation2 + $0x290] ss:$8 sps:$4 sm:$0xff]   ;;  %v3101_v21 = vld [vmem:[#allocation2 + $0x280] ss:$8 sps:$4 sm:$0xff]  }
  0xee   :  { %v3104_v22 = vld [vmem:[#allocation2 + $0x370] ss:$8 sps:$4 sm:$0xff]  }
  0xef   :  { %v202_v24 = vmax.bf16 %v3440_v0, %v200_v23  ;;  %v3106_v23 = vld [vmem:[#allocation2 + $0x374] ss:$8 sps:$4 sm:$0xff]  }
  0xf0   :  { %1239 = vmatprep.subr.bf16.mxu0 %v3106_v23  ;;  %v3167_v23 = vld [vmem:[#allocation2 + $0x420] ss:$8 sps:$4 sm:$0xff]  }
  0xf1   :  { %428 = vmatprep.mubr.bf16.mxu1 %v202_v24  ;;  %v3109_v24 = vld [vmem:[#allocation2 + $0x364] ss:$8 sps:$4 sm:$0xff]  }
  0xf2   :  { %429 = vmatmul.mubr.bf16.vlgmr.msra.gmra.mxu1 %v201_v25  ;;  %v3107_v25 = vld [vmem:[#allocation2 + $0x360] ss:$8 sps:$4 sm:$0xff]  }
  0xf3   :  { %959 = vmatpush1.bf16.msra.mxu1 %v3056_v32  ;;  %v3121_v32 = vld [vmem:[#allocation2 + $0x324] ss:$8 sps:$4 sm:$0xff]  }
  0xf4   :  { %960 = vmatprep.subr.bf16.mxu1 %v3061_v34  ;;  %v3124_v34 = vld [vmem:[#allocation2 + $0x314] ss:$8 sps:$4 sm:$0xff]  }
  0xf7   :  { %961 = vmatpush1.bf16.msra.mxu1 %v3059_v35  ;;  %v3122_v35 = vld [vmem:[#allocation2 + $0x310] ss:$8 sps:$4 sm:$0xff]  }
  0xf8   :  { %962 = vmatprep.subr.bf16.mxu1 %v3064_v36  ;;  %v3127_v36 = vld [vmem:[#allocation2 + $0x304] ss:$8 sps:$4 sm:$0xff]  }
  0xfb   :  { %963 = vmatpush1.bf16.msra.mxu1 %v3062_v37  ;;  %v3125_v37 = vld [vmem:[#allocation2 + $0x300] ss:$8 sps:$4 sm:$0xff]  }
  0xfc   :  { %964 = vmatprep.subr.bf16.mxu1 %v3067_v38  ;;  %v3130_v38 = vld [vmem:[#allocation2 + $0x3f4] ss:$8 sps:$4 sm:$0xff]  }
  0xff   :  { %965 = vmatpush1.bf16.msra.mxu1 %v3065_v39  ;;  %v3128_v39 = vld [vmem:[#allocation2 + $0x3f0] ss:$8 sps:$4 sm:$0xff]  }
 0x100   :  { %966 = vmatprep.subr.bf16.mxu1 %v3070_v40  ;;  %v3133_v40 = vld [vmem:[#allocation2 + $0x3e4] ss:$8 sps:$4 sm:$0xff]  }
 0x103   :  { %967 = vmatpush1.bf16.msra.mxu1 %v3068_v41  ;;  %v3131_v41 = vld [vmem:[#allocation2 + $0x3e0] ss:$8 sps:$4 sm:$0xff]  }
 0x104   :  { %968 = vmatprep.subr.bf16.mxu1 %v3073_v42  ;;  %v3136_v42 = vld [vmem:[#allocation2 + $0x3d4] ss:$8 sps:$4 sm:$0xff]  }
 0x107   :  { %969 = vmatpush1.bf16.msra.mxu1 %v3071_v43  ;;  %v3134_v43 = vld [vmem:[#allocation2 + $0x3d0] ss:$8 sps:$4 sm:$0xff]  }
 0x108   :  { %970 = vmatprep.subr.bf16.mxu1 %v3076_v44  ;;  %v3139_v44 = vld [vmem:[#allocation2 + $0x3c4] ss:$8 sps:$4 sm:$0xff]  }
 0x10b   :  { %971 = vmatpush1.bf16.msra.mxu1 %v3074_v45  ;;  %v3137_v45 = vld [vmem:[#allocation2 + $0x3c0] ss:$8 sps:$4 sm:$0xff]  }
 0x10c   :  { %972 = vmatprep.subr.bf16.mxu1 %v3079_v46  ;;  %v3142_v46 = vld [vmem:[#allocation2 + $0x3b4] ss:$8 sps:$4 sm:$0xff]  }
 0x10f   :  { %973 = vmatpush1.bf16.msra.mxu1 %v3077_v47  ;;  %v3140_v47 = vld [vmem:[#allocation2 + $0x3b0] ss:$8 sps:$4 sm:$0xff]  }
 0x110   :  { %974 = vmatprep.subr.bf16.mxu1 %v3082_v48  ;;  %v2704_v48 = vld.sshfl [vmem:[%s3599_s4 + $0x2] sm:$0x11 pattern:$0x75316420] }
 0x113   :  { %975 = vmatpush2.bf16.msra.mxu1 %v3080_v49  ;;  %v730_v49 = vcombine.high %v2704_v48, %v2704_v48 }
 0x114   :  { %976 = vmatprep.subr.bf16.mxu1 %v3085_v50  ;;  %v737_v50 = vrot.slane %v2704_v48, %v3503_v7 }
 0x117   :  { %977 = vmatpush2.bf16.msra.mxu1 %v3083_v51  ;;  %v744_v51 = vrot.slane %v730_v49, %v3503_v7 }
 0x118   :  { %978 = vmatprep.subr.bf16.mxu1 %v3088_v52 }
 0x11b   :  { %979 = vmatpush2.bf16.msra.mxu1 %v3086_v53  ;;  %v746_v53 = vpack.i.b16 %v737_v50, %v737_v50 }
 0x11c   :  { %980 = vmatprep.subr.bf16.mxu1 %v3091_v54  ;;  %v753_v54 = vpack.i.b16 %v744_v51, %v744_v51 }
 0x11e   :  { %v758_v59 = vrot.slane %v753_v54, %v3507_v13 }
 0x11f   :  { %981 = vmatpush2.bf16.msra.mxu1 %v3089_v55 }
 0x120   :  { %982 = vmatprep.subr.bf16.mxu1 %v3094_v56 }
 0x123   :  { %983 = vmatpush2.bf16.msra.mxu1 %v3092_v57  ;;  %v751_v57 = vrot.slane %v746_v53, %v3507_v13 }
 0x124   :  { %984 = vmatprep.subr.bf16.mxu1 %v3097_v16  ;;  %v3160_v16 = vld [vmem:[#allocation2 + $0x454] ss:$8 sps:$4 sm:$0xff]  }
 0x127   :  { %985 = vmatpush2.bf16.msra.mxu1 %v3095_v17  ;;  %v3158_v17 = vld [vmem:[#allocation2 + $0x450] ss:$8 sps:$4 sm:$0xff]  }
 0x128   :  { %986 = vmatprep.subr.bf16.mxu1 %v3100_v18  ;;  %v3163_v18 = vld [vmem:[#allocation2 + $0x444] ss:$8 sps:$4 sm:$0xff]  }
 0x12b   :  { %987 = vmatpush2.bf16.msra.mxu1 %v3098_v19  ;;  %v3161_v19 = vld [vmem:[#allocation2 + $0x440] ss:$8 sps:$4 sm:$0xff]  }
 0x12c   :  { %988 = vmatprep.subr.bf16.mxu1 %v3103_v20  ;;  %v3166_v20 = vld [vmem:[#allocation2 + $0x434] ss:$8 sps:$4 sm:$0xff]  }
 0x12f   :  { %989 = vmatpush2.bf16.msra.mxu1 %v3101_v21  ;;  %v3164_v21 = vld [vmem:[#allocation2 + $0x430] ss:$8 sps:$4 sm:$0xff]  }
 0x1b2   :  { %v430_v62 = vpop.f32.mrf.mxu1 }
 0x1b4   :  { %v432_v3 = vpop.f32.mrf.mxu1 }
 0x1b6   :  { %v434_v4 = vpop.f32.mrf.mxu1 }
 0x1b7   :  { %v439_v6 = vpack.c.bf16 %v434_v4, %v430_v62  ;;  %v3145_v4 = vld [vmem:[#allocation2 + $0x3a4] ss:$8 sps:$4 sm:$0xff]  }
 0x1b8   :  { %v436_v9 = vpop.f32.mrf.mxu1 }
 0x1b9   :  { %v440_v10 = vpack.c.bf16 %v436_v9, %v432_v3  ;;  %v478_v11 = vadd.bf16 %v470_v5, %v439_v6  ;;  %v3143_v5 = vld [vmem:[#allocation2 + $0x3a0] ss:$8 sps:$4 sm:$0xff]   ;;  %v3148_v6 = vld [vmem:[#allocation2 + $0x394] ss:$8 sps:$4 sm:$0xff]   ;;  %v3151_v9 = vld [vmem:[#allocation2 + $0x384] ss:$8 sps:$4 sm:$0xff]  }
 0x1bb   :  { %v479_v12 = vadd.bf16 %v477_v8, %v440_v10  ;;  %v480_v15 = vmax.bf16 %v3440_v0, %v478_v11  ;;  %v3146_v8 = vld [vmem:[#allocation2 + $0x390] ss:$8 sps:$4 sm:$0xff]   ;;  %v3149_v10 = vld [vmem:[#allocation2 + $0x380] ss:$8 sps:$4 sm:$0xff]  }
 0x1bc   :  { %v3152_v11 = vld [vmem:[#allocation2 + $0x470] ss:$8 sps:$4 sm:$0xff]  }
 0x1bd   :  { %v481_v14 = vmax.bf16 %v3440_v0, %v479_v12  ;;  %v3154_v12 = vld [vmem:[#allocation2 + $0x474] ss:$8 sps:$4 sm:$0xff]  }
 0x1be   :  { %1520 = vmatprep.subr.bf16.mxu1 %v3154_v12  ;;  %v3215_v12 = vld [vmem:[#allocation2 + $0x520] ss:$8 sps:$4 sm:$0xff]  }
 0x1bf   :  { %709 = vmatprep.mubr.bf16.mxu0 %v481_v14  ;;  %v3157_v14 = vld [vmem:[#allocation2 + $0x464] ss:$8 sps:$4 sm:$0xff]  }
 0x1c0   :  { %710 = vmatmul.mubr.bf16.vlgmr.msra.gmra.mxu0 %v480_v15  ;;  %v3155_v15 = vld [vmem:[#allocation2 + $0x460] ss:$8 sps:$4 sm:$0xff]  }
 0x1c1   :  { %1240 = vmatpush1.bf16.msra.mxu0 %v3104_v22  ;;  %v3169_v22 = vld [vmem:[#allocation2 + $0x424] ss:$8 sps:$4 sm:$0xff]  }
 0x1c2   :  { %1241 = vmatprep.subr.bf16.mxu0 %v3109_v24  ;;  %v3172_v24 = vld [vmem:[#allocation2 + $0x414] ss:$8 sps:$4 sm:$0xff]  }
 0x1c5   :  { %1242 = vmatpush1.bf16.msra.mxu0 %v3107_v25  ;;  %v3170_v25 = vld [vmem:[#allocation2 + $0x410] ss:$8 sps:$4 sm:$0xff]  }
 0x1c6   :  { %1243 = vmatprep.subr.bf16.mxu0 %v3112_v26  ;;  %v3175_v26 = vld [vmem:[#allocation2 + $0x404] ss:$8 sps:$4 sm:$0xff]  }
 0x1c9   :  { %1244 = vmatpush1.bf16.msra.mxu0 %v3110_v27  ;;  %v3173_v27 = vld [vmem:[#allocation2 + $0x400] ss:$8 sps:$4 sm:$0xff]  }
 0x1ca   :  { %1245 = vmatprep.subr.bf16.mxu0 %v3115_v28  ;;  %v3178_v28 = vld [vmem:[#allocation2 + $0x4f4] ss:$8 sps:$4 sm:$0xff]  }
 0x1cd   :  { %1246 = vmatpush1.bf16.msra.mxu0 %v3113_v29  ;;  %v3176_v29 = vld [vmem:[#allocation2 + $0x4f0] ss:$8 sps:$4 sm:$0xff]  }
 0x1ce   :  { %1247 = vmatprep.subr.bf16.mxu0 %v3118_v30  ;;  %v3181_v30 = vld [vmem:[#allocation2 + $0x4e4] ss:$8 sps:$4 sm:$0xff]  }
 0x1d1   :  { %1248 = vmatpush1.bf16.msra.mxu0 %v3116_v31  ;;  %v3179_v31 = vld [vmem:[#allocation2 + $0x4e0] ss:$8 sps:$4 sm:$0xff]  }
 0x1d2   :  { %1249 = vmatprep.subr.bf16.mxu0 %v3121_v32  ;;  %v3184_v32 = vld [vmem:[#allocation2 + $0x4d4] ss:$8 sps:$4 sm:$0xff]  }
 0x1d5   :  { %1250 = vmatpush1.bf16.msra.mxu0 %v3119_v33  ;;  %v3182_v33 = vld [vmem:[#allocation2 + $0x4d0] ss:$8 sps:$4 sm:$0xff]  }
 0x1d6   :  { %1251 = vmatprep.subr.bf16.mxu0 %v3124_v34  ;;  %v3187_v34 = vld [vmem:[#allocation2 + $0x4c4] ss:$8 sps:$4 sm:$0xff]  }
 0x1d9   :  { %1252 = vmatpush1.bf16.msra.mxu0 %v3122_v35  ;;  %v3185_v35 = vld [vmem:[#allocation2 + $0x4c0] ss:$8 sps:$4 sm:$0xff]  }
 0x1da   :  { %1253 = vmatprep.subr.bf16.mxu0 %v3127_v36  ;;  %v3190_v36 = vld [vmem:[#allocation2 + $0x4b4] ss:$8 sps:$4 sm:$0xff]  }
 0x1dd   :  { %1254 = vmatpush1.bf16.msra.mxu0 %v3125_v37  ;;  %v3188_v37 = vld [vmem:[#allocation2 + $0x4b0] ss:$8 sps:$4 sm:$0xff]  }
 0x1de   :  { %1255 = vmatprep.subr.bf16.mxu0 %v3130_v38  ;;  %v2738_v38 = vld.sshfl [vmem:[%s3599_s4 + $0x4] sm:$0x11 pattern:$0x75316420] }
 0x1e1   :  { %1256 = vmatpush2.bf16.msra.mxu0 %v3128_v39  ;;  %v1011_v39 = vcombine.high %v2738_v38, %v2738_v38 }
 0x1e2   :  { %1257 = vmatprep.subr.bf16.mxu0 %v3133_v40  ;;  %v1018_v40 = vrot.slane %v2738_v38, %v3503_v7 }
 0x1e5   :  { %1258 = vmatpush2.bf16.msra.mxu0 %v3131_v41  ;;  %v1025_v41 = vrot.slane %v1011_v39, %v3503_v7 }
 0x1e6   :  { %1259 = vmatprep.subr.bf16.mxu0 %v3136_v42 }
 0x1e9   :  { %1260 = vmatpush2.bf16.msra.mxu0 %v3134_v43  ;;  %v1027_v43 = vpack.i.b16 %v1018_v40, %v1018_v40 }
 0x1ea   :  { %1261 = vmatprep.subr.bf16.mxu0 %v3139_v44  ;;  %v1034_v44 = vpack.i.b16 %v1025_v41, %v1025_v41 }
 0x1ec   :  { %v1039_v49 = vrot.slane %v1034_v44, %v3507_v13 }
 0x1ed   :  { %1262 = vmatpush2.bf16.msra.mxu0 %v3137_v45 }
 0x1ee   :  { %1263 = vmatprep.subr.bf16.mxu0 %v3142_v46 }
 0x1f1   :  { %1264 = vmatpush2.bf16.msra.mxu0 %v3140_v47  ;;  %v1032_v47 = vrot.slane %v1027_v43, %v3507_v13 }
 0x1f2   :  { %1265 = vmatprep.subr.bf16.mxu0 %v3145_v4  ;;  %v3208_v4 = vld [vmem:[#allocation2 + $0x554] ss:$8 sps:$4 sm:$0xff]  }
 0x1f5   :  { %1266 = vmatpush2.bf16.msra.mxu0 %v3143_v5  ;;  %v3206_v5 = vld [vmem:[#allocation2 + $0x550] ss:$8 sps:$4 sm:$0xff]  }
 0x1f6   :  { %1267 = vmatprep.subr.bf16.mxu0 %v3148_v6  ;;  %v3211_v6 = vld [vmem:[#allocation2 + $0x544] ss:$8 sps:$4 sm:$0xff]  }
 0x1f9   :  { %1268 = vmatpush2.bf16.msra.mxu0 %v3146_v8  ;;  %v3209_v8 = vld [vmem:[#allocation2 + $0x540] ss:$8 sps:$4 sm:$0xff]  }
 0x1fa   :  { %1269 = vmatprep.subr.bf16.mxu0 %v3151_v9  ;;  %v3214_v9 = vld [vmem:[#allocation2 + $0x534] ss:$8 sps:$4 sm:$0xff]  }
 0x1fd   :  { %1270 = vmatpush2.bf16.msra.mxu0 %v3149_v10  ;;  %v3212_v10 = vld [vmem:[#allocation2 + $0x530] ss:$8 sps:$4 sm:$0xff]  }
 0x280   :  { %v711_v52 = vpop.f32.mrf.mxu0 }
 0x282   :  { %v713_v55 = vpop.f32.mrf.mxu0 }
 0x284   :  { %v715_v56 = vpop.f32.mrf.mxu0 }
 0x285   :  { %v720_v58 = vpack.c.bf16 %v715_v56, %v711_v52  ;;  %v3193_v56 = vld [vmem:[#allocation2 + $0x4a4] ss:$8 sps:$4 sm:$0xff]  }
 0x286   :  { %v717_v60 = vpop.f32.mrf.mxu0 }
 0x287   :  { %v721_v61 = vpack.c.bf16 %v717_v60, %v713_v55  ;;  %v759_v62 = vadd.bf16 %v751_v57, %v720_v58  ;;  %v3191_v57 = vld [vmem:[#allocation2 + $0x4a0] ss:$8 sps:$4 sm:$0xff]   ;;  %v3196_v58 = vld [vmem:[#allocation2 + $0x494] ss:$8 sps:$4 sm:$0xff]   ;;  %v3199_v60 = vld [vmem:[#allocation2 + $0x484] ss:$8 sps:$4 sm:$0xff]  }
 0x289   :  { %v760_v63 = vadd.bf16 %v758_v59, %v721_v61  ;;  %v761_v3 = vmax.bf16 %v3440_v0, %v759_v62  ;;  %v3194_v59 = vld [vmem:[#allocation2 + $0x490] ss:$8 sps:$4 sm:$0xff]   ;;  %v3197_v61 = vld [vmem:[#allocation2 + $0x480] ss:$8 sps:$4 sm:$0xff]  }
 0x28a   :  { %v3200_v62 = vld [vmem:[#allocation2 + $0x570] ss:$8 sps:$4 sm:$0xff]  }
 0x28b   :  { %v762_v2 = vmax.bf16 %v3440_v0, %v760_v63  ;;  %v3202_v63 = vld [vmem:[#allocation2 + $0x574] ss:$8 sps:$4 sm:$0xff]  }
 0x28c   :  { %1801 = vmatprep.subr.bf16.mxu0 %v3202_v63  ;;  %v3263_v63 = vld [vmem:[#allocation2 + $0x620] ss:$8 sps:$4 sm:$0xff]  }
 0x28d   :  { %990 = vmatprep.mubr.bf16.mxu1 %v762_v2  ;;  %v3205_v2 = vld [vmem:[#allocation2 + $0x564] ss:$8 sps:$4 sm:$0xff]  }
 0x28e   :  { %991 = vmatmul.mubr.bf16.vlgmr.msra.gmra.mxu1 %v761_v3  ;;  %v3203_v3 = vld [vmem:[#allocation2 + $0x560] ss:$8 sps:$4 sm:$0xff]  }
 0x28f   :  { %1521 = vmatpush1.bf16.msra.mxu1 %v3152_v11  ;;  %v3217_v11 = vld [vmem:[#allocation2 + $0x524] ss:$8 sps:$4 sm:$0xff]  }
 0x290   :  { %1522 = vmatprep.subr.bf16.mxu1 %v3157_v14  ;;  %v3220_v14 = vld [vmem:[#allocation2 + $0x514] ss:$8 sps:$4 sm:$0xff]  }
 0x293   :  { %1523 = vmatpush1.bf16.msra.mxu1 %v3155_v15  ;;  %v3218_v15 = vld [vmem:[#allocation2 + $0x510] ss:$8 sps:$4 sm:$0xff]  }
 0x294   :  { %1524 = vmatprep.subr.bf16.mxu1 %v3160_v16  ;;  %v3223_v16 = vld [vmem:[#allocation2 + $0x504] ss:$8 sps:$4 sm:$0xff]  }
 0x297   :  { %1525 = vmatpush1.bf16.msra.mxu1 %v3158_v17  ;;  %v3221_v17 = vld [vmem:[#allocation2 + $0x500] ss:$8 sps:$4 sm:$0xff]  }
 0x298   :  { %1526 = vmatprep.subr.bf16.mxu1 %v3163_v18  ;;  %v3226_v18 = vld [vmem:[#allocation2 + $0x5f4] ss:$8 sps:$4 sm:$0xff]  }
 0x29b   :  { %1527 = vmatpush1.bf16.msra.mxu1 %v3161_v19  ;;  %v3224_v19 = vld [vmem:[#allocation2 + $0x5f0] ss:$8 sps:$4 sm:$0xff]  }
 0x29c   :  { %1528 = vmatprep.subr.bf16.mxu1 %v3166_v20  ;;  %v3229_v20 = vld [vmem:[#allocation2 + $0x5e4] ss:$8 sps:$4 sm:$0xff]  }
 0x29f   :  { %1529 = vmatpush1.bf16.msra.mxu1 %v3164_v21  ;;  %v3227_v21 = vld [vmem:[#allocation2 + $0x5e0] ss:$8 sps:$4 sm:$0xff]  }
 0x2a0   :  { %1530 = vmatprep.subr.bf16.mxu1 %v3169_v22  ;;  %v3232_v22 = vld [vmem:[#allocation2 + $0x5d4] ss:$8 sps:$4 sm:$0xff]  }
 0x2a3   :  { %1531 = vmatpush1.bf16.msra.mxu1 %v3167_v23  ;;  %v3230_v23 = vld [vmem:[#allocation2 + $0x5d0] ss:$8 sps:$4 sm:$0xff]  }
 0x2a4   :  { %1532 = vmatprep.subr.bf16.mxu1 %v3172_v24  ;;  %v3235_v24 = vld [vmem:[#allocation2 + $0x5c4] ss:$8 sps:$4 sm:$0xff]  }
 0x2a7   :  { %1533 = vmatpush1.bf16.msra.mxu1 %v3170_v25  ;;  %v3233_v25 = vld [vmem:[#allocation2 + $0x5c0] ss:$8 sps:$4 sm:$0xff]  }
 0x2a8   :  { %1534 = vmatprep.subr.bf16.mxu1 %v3175_v26  ;;  %v3238_v26 = vld [vmem:[#allocation2 + $0x5b4] ss:$8 sps:$4 sm:$0xff]  }
 0x2ab   :  { %1535 = vmatpush1.bf16.msra.mxu1 %v3173_v27  ;;  %v3236_v27 = vld [vmem:[#allocation2 + $0x5b0] ss:$8 sps:$4 sm:$0xff]  }
 0x2ac   :  { %1536 = vmatprep.subr.bf16.mxu1 %v3178_v28  ;;  %v2772_v28 = vld.sshfl [vmem:[%s3599_s4 + $0x6] sm:$0x11 pattern:$0x75316420] }
 0x2af   :  { %1537 = vmatpush2.bf16.msra.mxu1 %v3176_v29  ;;  %v1292_v29 = vcombine.high %v2772_v28, %v2772_v28 }
 0x2b0   :  { %1538 = vmatprep.subr.bf16.mxu1 %v3181_v30  ;;  %v1299_v30 = vrot.slane %v2772_v28, %v3503_v7 }
 0x2b3   :  { %1539 = vmatpush2.bf16.msra.mxu1 %v3179_v31  ;;  %v1306_v31 = vrot.slane %v1292_v29, %v3503_v7 }
 0x2b4   :  { %1540 = vmatprep.subr.bf16.mxu1 %v3184_v32 }
 0x2b7   :  { %1541 = vmatpush2.bf16.msra.mxu1 %v3182_v33  ;;  %v1308_v33 = vpack.i.b16 %v1299_v30, %v1299_v30 }
 0x2b8   :  { %1542 = vmatprep.subr.bf16.mxu1 %v3187_v34  ;;  %v1315_v34 = vpack.i.b16 %v1306_v31, %v1306_v31 }
 0x2ba   :  { %v1320_v39 = vrot.slane %v1315_v34, %v3507_v13 }
 0x2bb   :  { %1543 = vmatpush2.bf16.msra.mxu1 %v3185_v35 }
 0x2bc   :  { %1544 = vmatprep.subr.bf16.mxu1 %v3190_v36 }
 0x2bf   :  { %1545 = vmatpush2.bf16.msra.mxu1 %v3188_v37  ;;  %v1313_v37 = vrot.slane %v1308_v33, %v3507_v13 }
 0x2c0   :  { %1546 = vmatprep.subr.bf16.mxu1 %v3193_v56  ;;  %v3256_v56 = vld [vmem:[#allocation2 + $0x654] ss:$8 sps:$4 sm:$0xff]  }
 0x2c3   :  { %1547 = vmatpush2.bf16.msra.mxu1 %v3191_v57  ;;  %v3254_v57 = vld [vmem:[#allocation2 + $0x650] ss:$8 sps:$4 sm:$0xff]  }
 0x2c4   :  { %1548 = vmatprep.subr.bf16.mxu1 %v3196_v58  ;;  %v3259_v58 = vld [vmem:[#allocation2 + $0x644] ss:$8 sps:$4 sm:$0xff]  }
 0x2c7   :  { %1549 = vmatpush2.bf16.msra.mxu1 %v3194_v59  ;;  %v3257_v59 = vld [vmem:[#allocation2 + $0x640] ss:$8 sps:$4 sm:$0xff]  }
 0x2c8   :  { %1550 = vmatprep.subr.bf16.mxu1 %v3199_v60  ;;  %v3262_v60 = vld [vmem:[#allocation2 + $0x634] ss:$8 sps:$4 sm:$0xff]  }
 0x2cb   :  { %1551 = vmatpush2.bf16.msra.mxu1 %v3197_v61  ;;  %v3260_v61 = vld [vmem:[#allocation2 + $0x630] ss:$8 sps:$4 sm:$0xff]  }
 0x34e   :  { %v992_v42 = vpop.f32.mrf.mxu1 }
 0x350   :  { %v994_v45 = vpop.f32.mrf.mxu1 }
 0x352   :  { %v996_v46 = vpop.f32.mrf.mxu1 }
 0x353   :  { %v1001_v48 = vpack.c.bf16 %v996_v46, %v992_v42  ;;  %v3241_v46 = vld [vmem:[#allocation2 + $0x5a4] ss:$8 sps:$4 sm:$0xff]  }
 0x354   :  { %v998_v50 = vpop.f32.mrf.mxu1 }
 0x355   :  { %v1002_v51 = vpack.c.bf16 %v998_v50, %v994_v45  ;;  %v1040_v52 = vadd.bf16 %v1032_v47, %v1001_v48  ;;  %v3239_v47 = vld [vmem:[#allocation2 + $0x5a0] ss:$8 sps:$4 sm:$0xff]   ;;  %v3244_v48 = vld [vmem:[#allocation2 + $0x594] ss:$8 sps:$4 sm:$0xff]   ;;  %v3247_v50 = vld [vmem:[#allocation2 + $0x584] ss:$8 sps:$4 sm:$0xff]  }
 0x357   :  { %v1041_v53 = vadd.bf16 %v1039_v49, %v1002_v51  ;;  %v1042_v55 = vmax.bf16 %v3440_v0, %v1040_v52  ;;  %v3242_v49 = vld [vmem:[#allocation2 + $0x590] ss:$8 sps:$4 sm:$0xff]   ;;  %v3245_v51 = vld [vmem:[#allocation2 + $0x580] ss:$8 sps:$4 sm:$0xff]  }
 0x358   :  { %v3248_v52 = vld [vmem:[#allocation2 + $0x670] ss:$8 sps:$4 sm:$0xff]  }
 0x359   :  { %v1043_v54 = vmax.bf16 %v3440_v0, %v1041_v53  ;;  %v3250_v53 = vld [vmem:[#allocation2 + $0x674] ss:$8 sps:$4 sm:$0xff]  }
 0x35a   :  { %2082 = vmatprep.subr.bf16.mxu1 %v3250_v53  ;;  %v3311_v53 = vld [vmem:[#allocation2 + $0x720] ss:$8 sps:$4 sm:$0xff]  }
 0x35b   :  { %1271 = vmatprep.mubr.bf16.mxu0 %v1043_v54  ;;  %v3253_v54 = vld [vmem:[#allocation2 + $0x664] ss:$8 sps:$4 sm:$0xff]  }
 0x35c   :  { %1272 = vmatmul.mubr.bf16.vlgmr.msra.gmra.mxu0 %v1042_v55  ;;  %v3251_v55 = vld [vmem:[#allocation2 + $0x660] ss:$8 sps:$4 sm:$0xff]  }
 0x35d   :  { %1802 = vmatpush1.bf16.msra.mxu0 %v3200_v62  ;;  %v3265_v62 = vld [vmem:[#allocation2 + $0x624] ss:$8 sps:$4 sm:$0xff]  }
 0x35e   :  { %1803 = vmatprep.subr.bf16.mxu0 %v3205_v2  ;;  %v3268_v2 = vld [vmem:[#allocation2 + $0x614] ss:$8 sps:$4 sm:$0xff]  }
 0x361   :  { %1804 = vmatpush1.bf16.msra.mxu0 %v3203_v3  ;;  %v3266_v3 = vld [vmem:[#allocation2 + $0x610] ss:$8 sps:$4 sm:$0xff]  }
 0x362   :  { %1805 = vmatprep.subr.bf16.mxu0 %v3208_v4  ;;  %v3271_v4 = vld [vmem:[#allocation2 + $0x604] ss:$8 sps:$4 sm:$0xff]  }
 0x365   :  { %1806 = vmatpush1.bf16.msra.mxu0 %v3206_v5  ;;  %v3269_v5 = vld [vmem:[#allocation2 + $0x600] ss:$8 sps:$4 sm:$0xff]  }
 0x366   :  { %1807 = vmatprep.subr.bf16.mxu0 %v3211_v6  ;;  %v3274_v6 = vld [vmem:[#allocation2 + $0x6f4] ss:$8 sps:$4 sm:$0xff]  }
 0x369   :  { %1808 = vmatpush1.bf16.msra.mxu0 %v3209_v8  ;;  %v3272_v8 = vld [vmem:[#allocation2 + $0x6f0] ss:$8 sps:$4 sm:$0xff]  }
 0x36a   :  { %1809 = vmatprep.subr.bf16.mxu0 %v3214_v9  ;;  %v3277_v9 = vld [vmem:[#allocation2 + $0x6e4] ss:$8 sps:$4 sm:$0xff]  }
 0x36d   :  { %1810 = vmatpush1.bf16.msra.mxu0 %v3212_v10  ;;  %v3275_v10 = vld [vmem:[#allocation2 + $0x6e0] ss:$8 sps:$4 sm:$0xff]  }
 0x36e   :  { %1811 = vmatprep.subr.bf16.mxu0 %v3217_v11  ;;  %v3280_v11 = vld [vmem:[#allocation2 + $0x6d4] ss:$8 sps:$4 sm:$0xff]  }
 0x371   :  { %1812 = vmatpush1.bf16.msra.mxu0 %v3215_v12  ;;  %v3278_v12 = vld [vmem:[#allocation2 + $0x6d0] ss:$8 sps:$4 sm:$0xff]  }
 0x372   :  { %1813 = vmatprep.subr.bf16.mxu0 %v3220_v14  ;;  %v3283_v14 = vld [vmem:[#allocation2 + $0x6c4] ss:$8 sps:$4 sm:$0xff]  }
 0x375   :  { %1814 = vmatpush1.bf16.msra.mxu0 %v3218_v15  ;;  %v3281_v15 = vld [vmem:[#allocation2 + $0x6c0] ss:$8 sps:$4 sm:$0xff]  }
 0x376   :  { %1815 = vmatprep.subr.bf16.mxu0 %v3223_v16  ;;  %v3286_v16 = vld [vmem:[#allocation2 + $0x6b4] ss:$8 sps:$4 sm:$0xff]  }
 0x379   :  { %1816 = vmatpush1.bf16.msra.mxu0 %v3221_v17  ;;  %v3284_v17 = vld [vmem:[#allocation2 + $0x6b0] ss:$8 sps:$4 sm:$0xff]  }
 0x37a   :  { %1817 = vmatprep.subr.bf16.mxu0 %v3226_v18  ;;  %v2806_v18 = vld.sshfl [vmem:[%s3599_s4 + $0x8] sm:$0x11 pattern:$0x75316420] }
 0x37d   :  { %1818 = vmatpush2.bf16.msra.mxu0 %v3224_v19  ;;  %v1573_v19 = vcombine.high %v2806_v18, %v2806_v18 }
 0x37e   :  { %1819 = vmatprep.subr.bf16.mxu0 %v3229_v20  ;;  %v1580_v20 = vrot.slane %v2806_v18, %v3503_v7 }
 0x381   :  { %1820 = vmatpush2.bf16.msra.mxu0 %v3227_v21  ;;  %v1587_v21 = vrot.slane %v1573_v19, %v3503_v7 }
 0x382   :  { %1821 = vmatprep.subr.bf16.mxu0 %v3232_v22 }
 0x385   :  { %1822 = vmatpush2.bf16.msra.mxu0 %v3230_v23  ;;  %v1589_v23 = vpack.i.b16 %v1580_v20, %v1580_v20 }
 0x386   :  { %1823 = vmatprep.subr.bf16.mxu0 %v3235_v24  ;;  %v1596_v24 = vpack.i.b16 %v1587_v21, %v1587_v21 }
 0x388   :  { %v1601_v29 = vrot.slane %v1596_v24, %v3507_v13 }
 0x389   :  { %1824 = vmatpush2.bf16.msra.mxu0 %v3233_v25 }
 0x38a   :  { %1825 = vmatprep.subr.bf16.mxu0 %v3238_v26 }
 0x38d   :  { %1826 = vmatpush2.bf16.msra.mxu0 %v3236_v27  ;;  %v1594_v27 = vrot.slane %v1589_v23, %v3507_v13 }
 0x38e   :  { %1827 = vmatprep.subr.bf16.mxu0 %v3241_v46  ;;  %v3304_v46 = vld [vmem:[#allocation2 + $0x754] ss:$8 sps:$4 sm:$0xff]  }
 0x391   :  { %1828 = vmatpush2.bf16.msra.mxu0 %v3239_v47  ;;  %v3302_v47 = vld [vmem:[#allocation2 + $0x750] ss:$8 sps:$4 sm:$0xff]  }
 0x392   :  { %1829 = vmatprep.subr.bf16.mxu0 %v3244_v48  ;;  %v3307_v48 = vld [vmem:[#allocation2 + $0x744] ss:$8 sps:$4 sm:$0xff]  }
 0x395   :  { %1830 = vmatpush2.bf16.msra.mxu0 %v3242_v49  ;;  %v3305_v49 = vld [vmem:[#allocation2 + $0x740] ss:$8 sps:$4 sm:$0xff]  }
 0x396   :  { %1831 = vmatprep.subr.bf16.mxu0 %v3247_v50  ;;  %v3310_v50 = vld [vmem:[#allocation2 + $0x734] ss:$8 sps:$4 sm:$0xff]  }
 0x399   :  { %1832 = vmatpush2.bf16.msra.mxu0 %v3245_v51  ;;  %v3308_v51 = vld [vmem:[#allocation2 + $0x730] ss:$8 sps:$4 sm:$0xff]  }
 0x41c   :  { %v1273_v32 = vpop.f32.mrf.mxu0 }
 0x41e   :  { %v1275_v35 = vpop.f32.mrf.mxu0 }
 0x420   :  { %v1277_v36 = vpop.f32.mrf.mxu0 }
 0x421   :  { %v1282_v38 = vpack.c.bf16 %v1277_v36, %v1273_v32  ;;  %v3289_v36 = vld [vmem:[#allocation2 + $0x6a4] ss:$8 sps:$4 sm:$0xff]  }
 0x422   :  { %v1279_v40 = vpop.f32.mrf.mxu0 }
 0x423   :  { %v1283_v41 = vpack.c.bf16 %v1279_v40, %v1275_v35  ;;  %v1321_v42 = vadd.bf16 %v1313_v37, %v1282_v38  ;;  %v3287_v37 = vld [vmem:[#allocation2 + $0x6a0] ss:$8 sps:$4 sm:$0xff]   ;;  %v3292_v38 = vld [vmem:[#allocation2 + $0x694] ss:$8 sps:$4 sm:$0xff]   ;;  %v3295_v40 = vld [vmem:[#allocation2 + $0x684] ss:$8 sps:$4 sm:$0xff]  }
 0x425   :  { %v1322_v43 = vadd.bf16 %v1320_v39, %v1283_v41  ;;  %v1323_v45 = vmax.bf16 %v3440_v0, %v1321_v42  ;;  %v3290_v39 = vld [vmem:[#allocation2 + $0x690] ss:$8 sps:$4 sm:$0xff]   ;;  %v3293_v41 = vld [vmem:[#allocation2 + $0x680] ss:$8 sps:$4 sm:$0xff]  }
 0x426   :  { %v3296_v42 = vld [vmem:[#allocation2 + $0x770] ss:$8 sps:$4 sm:$0xff]  }
 0x427   :  { %v1324_v44 = vmax.bf16 %v3440_v0, %v1322_v43  ;;  %v3298_v43 = vld [vmem:[#allocation2 + $0x774] ss:$8 sps:$4 sm:$0xff]  }
 0x428   :  { %2363 = vmatprep.subr.bf16.mxu0 %v3298_v43 }
 0x429   :  { %1552 = vmatprep.mubr.bf16.mxu1 %v1324_v44  ;;  %v3301_v44 = vld [vmem:[#allocation2 + $0x764] ss:$8 sps:$4 sm:$0xff]  }
 0x42a   :  { %1553 = vmatmul.mubr.bf16.vlgmr.msra.gmra.mxu1 %v1323_v45  ;;  %v3299_v45 = vld [vmem:[#allocation2 + $0x760] ss:$8 sps:$4 sm:$0xff]  }
 0x42b   :  { %2083 = vmatpush1.bf16.msra.mxu1 %v3248_v52  ;;  %v3313_v52 = vld [vmem:[#allocation2 + $0x724] ss:$8 sps:$4 sm:$0xff]  }
 0x42c   :  { %2084 = vmatprep.subr.bf16.mxu1 %v3253_v54  ;;  %v3316_v54 = vld [vmem:[#allocation2 + $0x714] ss:$8 sps:$4 sm:$0xff]  }
 0x42f   :  { %2085 = vmatpush1.bf16.msra.mxu1 %v3251_v55  ;;  %v3314_v55 = vld [vmem:[#allocation2 + $0x710] ss:$8 sps:$4 sm:$0xff]  }
 0x430   :  { %2086 = vmatprep.subr.bf16.mxu1 %v3256_v56  ;;  %v3319_v56 = vld [vmem:[#allocation2 + $0x704] ss:$8 sps:$4 sm:$0xff]  }
 0x433   :  { %2087 = vmatpush1.bf16.msra.mxu1 %v3254_v57  ;;  %v3317_v57 = vld [vmem:[#allocation2 + $0x700] ss:$8 sps:$4 sm:$0xff]  }
 0x434   :  { %2088 = vmatprep.subr.bf16.mxu1 %v3259_v58  ;;  %v3322_v58 = vld [vmem:[#allocation2 + $0x7f4] ss:$8 sps:$4 sm:$0xff]  }
 0x437   :  { %2089 = vmatpush1.bf16.msra.mxu1 %v3257_v59  ;;  %v3320_v59 = vld [vmem:[#allocation2 + $0x7f0] ss:$8 sps:$4 sm:$0xff]  }
 0x438   :  { %2090 = vmatprep.subr.bf16.mxu1 %v3262_v60  ;;  %v3325_v60 = vld [vmem:[#allocation2 + $0x7e4] ss:$8 sps:$4 sm:$0xff]  }
 0x43b   :  { %2091 = vmatpush1.bf16.msra.mxu1 %v3260_v61  ;;  %v3323_v61 = vld [vmem:[#allocation2 + $0x7e0] ss:$8 sps:$4 sm:$0xff]  }
 0x43c   :  { %2092 = vmatprep.subr.bf16.mxu1 %v3265_v62  ;;  %v3328_v62 = vld [vmem:[#allocation2 + $0x7d4] ss:$8 sps:$4 sm:$0xff]  }
 0x43f   :  { %2093 = vmatpush1.bf16.msra.mxu1 %v3263_v63  ;;  %v3326_v63 = vld [vmem:[#allocation2 + $0x7d0] ss:$8 sps:$4 sm:$0xff]  }
 0x440   :  { %2094 = vmatprep.subr.bf16.mxu1 %v3268_v2  ;;  %v3331_v2 = vld [vmem:[#allocation2 + $0x7c4] ss:$8 sps:$4 sm:$0xff]  }
 0x443   :  { %2095 = vmatpush1.bf16.msra.mxu1 %v3266_v3  ;;  %v3329_v3 = vld [vmem:[#allocation2 + $0x7c0] ss:$8 sps:$4 sm:$0xff]  }
 0x444   :  { %2096 = vmatprep.subr.bf16.mxu1 %v3271_v4  ;;  %v3334_v4 = vld [vmem:[#allocation2 + $0x7b4] ss:$8 sps:$4 sm:$0xff]  }
 0x447   :  { %2097 = vmatpush1.bf16.msra.mxu1 %v3269_v5  ;;  %v3332_v5 = vld [vmem:[#allocation2 + $0x7b0] ss:$8 sps:$4 sm:$0xff]  }
 0x448   :  { %2098 = vmatprep.subr.bf16.mxu1 %v3274_v6  ;;  %v2840_v6 = vld.sshfl [vmem:[%s3599_s4 + $0xa] sm:$0x11 pattern:$0x75316420] }
 0x44b   :  { %2099 = vmatpush2.bf16.msra.mxu1 %v3272_v8  ;;  %v1854_v8 = vcombine.high %v2840_v6, %v2840_v6 }
 0x44c   :  { %2100 = vmatprep.subr.bf16.mxu1 %v3277_v9  ;;  %v1861_v9 = vrot.slane %v2840_v6, %v3503_v7 }
 0x44f   :  { %2101 = vmatpush2.bf16.msra.mxu1 %v3275_v10  ;;  %v1868_v10 = vrot.slane %v1854_v8, %v3503_v7 }
 0x450   :  { %2102 = vmatprep.subr.bf16.mxu1 %v3280_v11 }
 0x453   :  { %2103 = vmatpush2.bf16.msra.mxu1 %v3278_v12  ;;  %v1870_v12 = vpack.i.b16 %v1861_v9, %v1861_v9 }
 0x454   :  { %2104 = vmatprep.subr.bf16.mxu1 %v3283_v14  ;;  %v1877_v14 = vpack.i.b16 %v1868_v10, %v1868_v10 }
 0x456   :  { %v1882_v19 = vrot.slane %v1877_v14, %v3507_v13 }
 0x457   :  { %2105 = vmatpush2.bf16.msra.mxu1 %v3281_v15 }
 0x458   :  { %2106 = vmatprep.subr.bf16.mxu1 %v3286_v16 }
 0x45b   :  { %2107 = vmatpush2.bf16.msra.mxu1 %v3284_v17  ;;  %v1875_v17 = vrot.slane %v1870_v12, %v3507_v13 }
 0x45c   :  { %2108 = vmatprep.subr.bf16.mxu1 %v3289_v36  ;;  %v3348_v36 = vld [vmem:[#allocation5 + $0x68] sm:$0xff]  }
 0x45f   :  { %2109 = vmatpush2.bf16.msra.mxu1 %v3287_v37  ;;  %v3349_v37 = vld [vmem:[#allocation5 + $0x28] sm:$0xff]  }
 0x460   :  { %2110 = vmatprep.subr.bf16.mxu1 %v3292_v38  ;;  %v3350_v38 = vld [vmem:[#allocation5 + $0x60] sm:$0xff]  }
 0x463   :  { %2111 = vmatpush2.bf16.msra.mxu1 %v3290_v39  ;;  %v3351_v39 = vld [vmem:[#allocation5 + $0x20] sm:$0xff]  }
 0x464   :  { %2112 = vmatprep.subr.bf16.mxu1 %v3295_v40  ;;  %v3352_v40 = vld [vmem:[#allocation5 + $0x58] sm:$0xff]  }
 0x467   :  { %2113 = vmatpush2.bf16.msra.mxu1 %v3293_v41  ;;  %v3353_v41 = vld [vmem:[#allocation5 + $0x18] sm:$0xff]  }
 0x4ea   :  { %v1554_v22 = vpop.f32.mrf.mxu1 }
 0x4ec   :  { %v1556_v25 = vpop.f32.mrf.mxu1 }
 0x4ee   :  { %v1558_v26 = vpop.f32.mrf.mxu1 }
 0x4ef   :  { %v1563_v28 = vpack.c.bf16 %v1558_v26, %v1554_v22  ;;  %v3337_v26 = vld [vmem:[#allocation2 + $0x7a4] ss:$8 sps:$4 sm:$0xff]  }
 0x4f0   :  { %v1560_v30 = vpop.f32.mrf.mxu1 }
 0x4f1   :  { %v1564_v31 = vpack.c.bf16 %v1560_v30, %v1556_v25  ;;  %v1602_v32 = vadd.bf16 %v1594_v27, %v1563_v28  ;;  %v3335_v27 = vld [vmem:[#allocation2 + $0x7a0] ss:$8 sps:$4 sm:$0xff]   ;;  %v3340_v28 = vld [vmem:[#allocation2 + $0x794] ss:$8 sps:$4 sm:$0xff]   ;;  %v3343_v30 = vld [vmem:[#allocation2 + $0x784] ss:$8 sps:$4 sm:$0xff]  }
 0x4f3   :  { %v1603_v33 = vadd.bf16 %v1601_v29, %v1564_v31  ;;  %v1604_v35 = vmax.bf16 %v3440_v0, %v1602_v32  ;;  %v3338_v29 = vld [vmem:[#allocation2 + $0x790] ss:$8 sps:$4 sm:$0xff]   ;;  %v3341_v31 = vld [vmem:[#allocation2 + $0x780] ss:$8 sps:$4 sm:$0xff]  }
 0x4f4   :  { %v3344_v32 = vld [vmem:[#allocation5 + $0x78] sm:$0xff]  }
 0x4f5   :  { %v1605_v34 = vmax.bf16 %v3440_v0, %v1603_v33  ;;  %v3345_v33 = vld [vmem:[#allocation5 + $0x38] sm:$0xff]   ;;  %2926 = vmatprep.subr.bf16.mxu1 %v3344_v32 }
 0x4f7   :  { %1833 = vmatprep.mubr.bf16.mxu0 %v1605_v34  ;;  %v3346_v34 = vld [vmem:[#allocation5 + $0x70] sm:$0xff]  }
 0x4f8   :  { %1834 = vmatmul.mubr.bf16.vlgmr.msra.gmra.mxu0 %v1604_v35  ;;  %v3347_v35 = vld [vmem:[#allocation5 + $0x30] sm:$0xff]  }
 0x4f9   :  { %2364 = vmatpush1.bf16.msra.mxu0 %v3296_v42  ;;  %v2874_v42 = vld.sshfl [vmem:[%s3599_s4 + $0xc] sm:$0x11 pattern:$0x75316420] }
 0x4fa   :  { %2365 = vmatprep.subr.bf16.mxu0 %v3301_v44  ;;  %v2135_v43 = vcombine.high %v2874_v42, %v2874_v42  ;;  %v2142_v44 = vrot.slane %v2874_v42, %v3503_v7 }
 0x4fd   :  { %2366 = vmatpush1.bf16.msra.mxu0 %v3299_v45  ;;  %v2149_v45 = vrot.slane %v2135_v43, %v3503_v7 }
 0x4fe   :  { %2367 = vmatprep.subr.bf16.mxu0 %v3304_v46 }
 0x501   :  { %2368 = vmatpush1.bf16.msra.mxu0 %v3302_v47  ;;  %v2151_v47 = vpack.i.b16 %v2142_v44, %v2142_v44 }
 0x502   :  { %2369 = vmatprep.subr.bf16.mxu0 %v3307_v48  ;;  %v2158_v48 = vpack.i.b16 %v2149_v45, %v2149_v45 }
 0x505   :  { %2370 = vmatpush1.bf16.msra.mxu0 %v3305_v49 }
 0x506   :  { %2371 = vmatprep.subr.bf16.mxu0 %v3310_v50 }
 0x509   :  { %2372 = vmatpush1.bf16.msra.mxu0 %v3308_v51  ;;  %v2156_v51 = vrot.slane %v2151_v47, %v3507_v13 }
 0x50a   :  { %2373 = vmatprep.subr.bf16.mxu0 %v3313_v52 }
 0x50d   :  { %2374 = vmatpush1.bf16.msra.mxu0 %v3311_v53  ;;  %v2163_v53 = vrot.slane %v2158_v48, %v3507_v13 }
 0x50e   :  { %2375 = vmatprep.subr.bf16.mxu0 %v3316_v54 }
 0x511   :  { %2376 = vmatpush1.bf16.msra.mxu0 %v3314_v55 }
 0x512   :  { %2377 = vmatprep.subr.bf16.mxu0 %v3319_v56 }
 0x515   :  { %2378 = vmatpush1.bf16.msra.mxu0 %v3317_v57 }
 0x516   :  { %2379 = vmatprep.subr.bf16.mxu0 %v3322_v58 }
 0x519   :  { %2380 = vmatpush2.bf16.msra.mxu0 %v3320_v59 }
 0x51a   :  { %2381 = vmatprep.subr.bf16.mxu0 %v3325_v60  ;;  %v3354_v60 = vld [vmem:[#allocation5 + $0x50] sm:$0xff]  }
 0x51d   :  { %2382 = vmatpush2.bf16.msra.mxu0 %v3323_v61  ;;  %v3355_v61 = vld [vmem:[#allocation5 + $0x10] sm:$0xff]  }
 0x51e   :  { %2383 = vmatprep.subr.bf16.mxu0 %v3328_v62  ;;  %v3356_v62 = vld [vmem:[#allocation5 + $0x48] sm:$0xff]  }
 0x521   :  { %2384 = vmatpush2.bf16.msra.mxu0 %v3326_v63  ;;  %v3357_v63 = vld [vmem:[#allocation5 + $0x8] sm:$0xff]  }
 0x522   :  { %2385 = vmatprep.subr.bf16.mxu0 %v3331_v2  ;;  %v3358_v2 = vld [vmem:[#allocation5 + $0x40] sm:$0xff]  }
 0x525   :  { %2386 = vmatpush2.bf16.msra.mxu0 %v3329_v3  ;;  %v3359_v3 = vld [vmem:[#allocation5] sm:$0xff]  }
 0x526   :  { %2387 = vmatprep.subr.bf16.mxu0 %v3334_v4  ;;  %v2908_v4 = vld.sshfl [vmem:[%s3599_s4 + $0xe] sm:$0x11 pattern:$0x75316420] }
 0x527   :  { %v2423_v6 = vrot.slane %v2908_v4, %v3503_v7 }
 0x529   :  { %2388 = vmatpush2.bf16.msra.mxu0 %v3332_v5  ;;  %v2416_v5 = vcombine.high %v2908_v4, %v2908_v4  ;;  %v2432_v10 = vpack.i.b16 %v2423_v6, %v2423_v6 }
 0x52a   :  { %2389 = vmatprep.subr.bf16.mxu0 %v3337_v26 }
 0x52b   :  { %v2430_v8 = vrot.slane %v2416_v5, %v3503_v7 }
 0x52d   :  { %2390 = vmatpush2.bf16.msra.mxu0 %v3335_v27 }
 0x52e   :  { %2391 = vmatprep.subr.bf16.mxu0 %v3340_v28 }
 0x531   :  { %2392 = vmatpush2.bf16.msra.mxu0 %v3338_v29 }
 0x532   :  { %2393 = vmatprep.subr.bf16.mxu0 %v3343_v30 }
 0x535   :  { %2394 = vmatpush2.bf16.msra.mxu0 %v3341_v31 }
 0x5b8   :  { %v1835_v11 = vpop.f32.mrf.mxu0 }
 0x5ba   :  { %v1837_v15 = vpop.f32.mrf.mxu0 }
 0x5bc   :  { %v1839_v16 = vpop.f32.mrf.mxu0 }
 0x5bd   :  { %v1844_v18 = vpack.c.bf16 %v1839_v16, %v1835_v11  ;;  %v2439_v11 = vpack.i.b16 %v2430_v8, %v2430_v8 }
 0x5be   :  { %v1841_v20 = vpop.f32.mrf.mxu0 }
 0x5bf   :  { %v1845_v21 = vpack.c.bf16 %v1841_v20, %v1837_v15  ;;  %v1883_v22 = vadd.bf16 %v1875_v17, %v1844_v18  ;;  %v2437_v15 = vrot.slane %v2432_v10, %v3507_v13  ;;  %v2444_v17 = vrot.slane %v2439_v11, %v3507_v13 }
 0x5c1   :  { %v1884_v23 = vadd.bf16 %v1882_v19, %v1845_v21  ;;  %v1885_v25 = vmax.bf16 %v3440_v0, %v1883_v22 }
 0x5c3   :  { %v1886_v24 = vmax.bf16 %v3440_v0, %v1884_v23 }
 0x5c5   :  { %2114 = vmatprep.mubr.bf16.mxu1 %v1886_v24  ;;  %v2909_v24 = vld [vmem:[%s3601_s6] ss:$0 sm:$0xff]  ;;  %s3442_s6 = smov [#allocation7]  }
 0x5c6   :  { %2115 = vmatmul.mubr.bf16.vlgmr.msra.gmra.mxu1 %v1885_v25  ;;  %s2619_s12 = sshll.u32 %s3442_s6, 4  ;;  %s2620_s12 = int_to_ptr.vmem [resolvable:$true] %s2619_s12 }
 0x5c7   :  { %2927 = vmatpush3.bf16.msra.mxu1 %v3345_v33  ;;  %s3408_s13 = scalar_lea.vmem %s2620_s12, 256  ;;  %p3413_p11 = scmp.lt.s32.totalorder %s2620_s12, %s2620_s12 }
 0x5c8   :  { %2928 = vmatprep.subr.bf16.mxu1 %v3346_v34  ;;  %p3409_p10 = scmp.ne.s32.totalorder %s2620_s12, %s3408_s13  ;;  %p3414_p12 = scmp.lt.s32.totalorder %s3408_s13, %s3408_s13 }
 0x5ca   :  { %p3415_p13 = por %p3414_p12, %p3413_p11 }
 0x5cb   :  { %2929 = vmatpush3.bf16.msra.mxu1 %v3347_v35 }
 0x5cc   :  { %2930 = vmatprep.subr.bf16.mxu1 %v3348_v36  ;;  %p3416_p0 = pnand %p3415_p13, %p3409_p10 }
 0x5cf   :  { %2931 = vmatpush3.bf16.msra.mxu1 %v3349_v37 }
 0x5d0   :  { %2932 = vmatprep.subr.bf16.mxu1 %v3350_v38 }
 0x5d3   :  { %2933 = vmatpush3.bf16.msra.mxu1 %v3351_v39 }
 0x5d4   :  { %2934 = vmatprep.subr.bf16.mxu1 %v3352_v40  ;;  %v92_v40 = vand.u32 127, %v91_v1 }
 0x5d6   :  { %vm93_vm2 = vcmp.ge.s32.totalorder %v92_v40, 4 }
 0x5d7   :  { %2935 = vmatpush3.bf16.msra.mxu1 %v3353_v41 }
 0x5d8   :  { %2936 = vmatprep.subr.bf16.mxu1 %v3354_v60 }
 0x5db   :  { %2937 = vmatpush3.bf16.msra.mxu1 %v3355_v61 }
 0x5dc   :  { %2938 = vmatprep.subr.bf16.mxu1 %v3356_v62 }
 0x5df   :  { %2939 = vmatpush3.bf16.msra.mxu1 %v3357_v63 }
 0x5e0   :  { %2940 = vmatprep.subr.bf16.mxu1 %v3358_v2 }
 0x5e3   :  { %2941 = vmatpush3.bf16.msra.mxu1 %v3359_v3 }
 0x686   :  { %v2116_v46 = vpop.f32.mrf.mxu1 }
 0x688   :  { %v2118_v49 = vpop.f32.mrf.mxu1 }
 0x68a   :  { %v2120_v50 = vpop.f32.mrf.mxu1 }
 0x68b   :  { %v2125_v52 = vpack.c.bf16 %v2120_v50, %v2116_v46 }
 0x68c   :  { %v2122_v54 = vpop.f32.mrf.mxu1 }
 0x68d   :  { %v2126_v55 = vpack.c.bf16 %v2122_v54, %v2118_v49  ;;  %v2164_v56 = vadd.bf16 %v2156_v51, %v2125_v52 }
 0x68f   :  { %v2165_v57 = vadd.bf16 %v2163_v53, %v2126_v55  ;;  %v2166_v59 = vmax.bf16 %v3440_v0, %v2164_v56 }
 0x691   :  { %v2167_v58 = vmax.bf16 %v3440_v0, %v2165_v57 }
 0x693   :  { %2395 = vmatprep.mubr.bf16.mxu0 %v2167_v58 }
 0x694   :  { %2396 = vmatmul.mubr.bf16.vlgmr.msra.gmra.mxu0 %v2166_v59 }
 0x754   :  { %v2397_v9 = vpop.f32.mrf.mxu0 }
 0x756   :  { %v2399_v12 = vpop.f32.mrf.mxu0 }
 0x758   :  { %v2401_v14 = vpop.f32.mrf.mxu0 }
 0x759   :  { %v2406_v16 = vpack.c.bf16 %v2401_v14, %v2397_v9 }
 0x75a   :  { %v2403_v18 = vpop.f32.mrf.mxu0 }
 0x75b   :  { %v2407_v19 = vpack.c.bf16 %v2403_v18, %v2399_v12  ;;  %v2445_v20 = vadd.bf16 %v2437_v15, %v2406_v16 }
 0x75d   :  { %v2446_v21 = vadd.bf16 %v2444_v17, %v2407_v19  ;;  %v2447_v23 = vmax.bf16 %v3440_v0, %v2445_v20 }
 0x75f   :  { %v2448_v22 = vmax.bf16 %v3440_v0, %v2446_v21 }
 0x761   :  { %2583 = vmatprep.mubr.bf16.mxu1 %v2448_v22 }
 0x762   :  { %2584 = vmatmul.mubr.bf16.vlgmr.msra.gmra.mxu1 %v2447_v23 }
 0x822   :  { %v2942_v7 = vpop.f32.mrf.mxu1 }
 0x824   :  { %v2943_v25 = vpop.f32.mrf.mxu1 }
 0x825   :  { %v2944_v26 = vadd.f32 %v2943_v25, %v2942_v7 }
 0x826   :  { %v2945_v27 = vpop.f32.mrf.mxu1 }
 0x827   :  { %v2586_v28 = vadd.f32 %v2944_v26, %v2909_v24 }
 0x828   :  { %v2946_v13 = vpop.f32.mrf.mxu1 }
 0x829   :  { %v2594_v29 = vand.u32 2147483647, %v2586_v28  ;;  %v2947_v30 = vadd.f32 %v2946_v13, %v2945_v27  ;;  %v2592_v42 = vmax.f32 %v2586_v28, 0.0 }
 0x82b   :  { %v2596_v31 = vsub.f32 0.0, %v2594_v29  ;;  %v2589_v32 = vadd.f32 %v2947_v30, %v2909_v24 }
 0x82d   :  { %v2598_v33 = vmul.f32 1.442695, %v2596_v31  ;;  %v2595_v34 = vand.u32 2147483647, %v2589_v32  ;;  %v2593_v46 = vmax.f32 %v2589_v32, 0.0 }
 0x82f   :  { %3360 = vpow2.f32 %v2598_v33  ;;  %v2597_v0 = vsub.f32 0.0, %v2595_v34 }
 0x831   :  { %v2600_v35 = vmul.f32 1.442695, %v2597_v0 }
 0x833   :  { %3362 = vpow2.f32 %v2600_v35 }
 0x83c   :  { %v3361_v36 = vpop.eup %3360 }
 0x83d   :  { %v2602_v37 = vadd.f32 1.0, %v3361_v36 }
 0x83f   :  { %3364 = vlog2.f32 %v2602_v37 }
 0x840   :  { %v3363_v38 = vpop.eup %3362 }
 0x841   :  { %v2603_v39 = vadd.f32 1.0, %v3363_v38 }
 0x843   :  { %3366 = vlog2.f32 %v2603_v39 }
 0x84c   :  { %v3365_v41 = vpop.eup %3364 }
 0x84d   :  { %v2605_v43 = vmul.f32 0.6931472, %v3365_v41 }
 0x84f   :  { %v2608_v44 = vadd.f32 %v2605_v43, %v2592_v42 }
 0x850   :  { %v3367_v45 = vpop.eup %3366 }
 0x851   :  { %v2607_v47 = vmul.f32 0.6931472, %v3367_v45  ;;  %v2610_v48 = vsel %vm93_vm2, %v2608_v44, %v2586_v28 }
 0x852   :  { %2612 = vst [vmem:[#allocation7] sm:$0xff] %v2610_v48 }
 0x853   :  { %v2609_v49 = vadd.f32 %v2607_v47, %v2593_v46 }
 0x855   :  { %v2611_v50 = vsel %vm93_vm2, %v2609_v49, %v2589_v32 }
 0x856   :  { %2613 = vst [vmem:[#allocation7 + $0x8] sm:$0xff] %v2611_v50 }
 0x857   :  { %3419 = shalt.err (!%p3416_p0)
}
 0x858   :  { %2625 = dma.vmem_to_hbm [thread:$0]  %s2620_s12, 256, %s3602_s7, [#allocation4], %s3435_s27, %s3435_s27, %s3436_s28  }
 0x859   :  { %3432 = dma.done.wait [#allocation4], 256  }
 0x85a   :  { %3433 = vsyncadd [#allocation4], 4294967040 }
 0x85b   :  { %2629 = vsyncpa [#allocation3], 1 }
 0x85c   :  { %2630 = vsyncpa [#allocation6], 1 }
 0x85d   :  { %2631 = vsyncpa [#allocation4], 1 }

</bundles_post_ra>
